<compile_context>
chip_gen: v5e
topology: v5e:2x2
jax: 0.10.0
libtpu: 0.0.40
codegen_flags: <defaults>
</compile_context>

<pallas_src>
import functools
import numpy as np
import jax
import jax.numpy as jnp
from jax.experimental import pallas as pl
from jax.experimental.pallas import tpu as pltpu


def basic_block_kernel(x_ref, w1_ref, w2_ref, b1_ref, b2_ref, out_ref, ybuf_ref,
                       *, nb, h):
    """Processes nb images per grid step, stacked along rows.

    x_ref   : (nb*(h+2), W*Cin)   bf16 row-padded input, (W,Cin) packed in lanes
    w1_ref  : (3, W*Cin, W*Cout)  bf16 banded conv1 weights (BN1 scale folded)
    w2_ref  : (3, W*Cout, W*Cout) bf16 banded conv2 weights (BN2 scale folded)
    b1_ref  : (1, W*Cout) f32   BN1 bias tiled over W
    b2_ref  : (1, W*Cout) f32   BN2 bias tiled over W
    out_ref : (nb*h, W*Cout) bf16
    ybuf_ref: (nb*(h+2), W*Cout) bf16 VMEM scratch (row-padded intermediate)
    """
    hp2 = h + 2
    r = nb * hp2
    wco = out_ref.shape[1]

    # ---- conv1 (+ BN1 scale): 3 lane-dense banded matmuls over the whole
    #      nb-image slab (M = r-2 ~ nb*h). ----
    acc = jnp.dot(x_ref[0:r - 2, :], w1_ref[0], preferred_element_type=jnp.float32)
    acc += jnp.dot(x_ref[1:r - 1, :], w1_ref[1], preferred_element_type=jnp.float32)
    acc += jnp.dot(x_ref[2:r, :], w1_ref[2], preferred_element_type=jnp.float32)

    # BN1 bias + ReLU; single f32->bf16 cast for the conv2 MXU operands.
    y1 = jnp.maximum(acc + b1_ref[...], 0.0).astype(jnp.bfloat16)      # (r-2, wco)

    # Row-padded bf16 intermediate: one bulk interior store, then zero the
    # 2*nb halo rows (outer halos + rows straddling image boundaries, which
    # hold garbage from the slab matmul).  Re-zeroed every step: cheap, and
    # megacore-safe (per-core scratch; a program_id==0 guard would miss cores
    # that start at a later grid index).
    ybuf_ref[1:r - 1, :] = y1
    zrow = jnp.zeros((1, wco), jnp.bfloat16)
    z2 = jnp.zeros((2, wco), jnp.bfloat16)
    ybuf_ref[0:1, :] = zrow
    ybuf_ref[r - 1:r, :] = zrow
    for n in range(nb - 1):
        ybuf_ref[(n + 1) * hp2 - 1:(n + 1) * hp2 + 1, :] = z2

    # ---- conv2 (+ BN2 scale): 3 banded matmuls on the bf16 intermediate ----
    acc2 = jnp.dot(ybuf_ref[0:r - 2, :], w2_ref[0], preferred_element_type=jnp.float32)
    acc2 += jnp.dot(ybuf_ref[1:r - 1, :], w2_ref[1], preferred_element_type=jnp.float32)
    acc2 += jnp.dot(ybuf_ref[2:r, :], w2_ref[2], preferred_element_type=jnp.float32)

    # BN2 bias + residual (identity; Cin == Cout so lane packing matches) + ReLU.
    out_full = jnp.maximum(
        acc2 + b2_ref[...] + x_ref[1:r - 1, :].astype(jnp.float32), 0.0
    ).astype(out_ref.dtype)                                            # (r-2, wco)

    # Drop per-image garbage boundary rows: stage through the (now dead) ybuf
    # and copy the h valid rows of each image (ref->ref, aligned output stores).
    ybuf_ref[0:r - 2, :] = out_full
    for n in range(nb):
        out_ref[n * h:(n + 1) * h, :] = ybuf_ref[n * hp2:n * hp2 + h, :]


def make_band(w_hwio_np, W):
    """Banded weights: band[kh, wi*Cin+ci, wo*Cout+co] = w[kh, wi-wo+1, ci, co]
    (zero when the width tap falls outside [0, W) -> width zero-pad folded in)."""
    KH, KW, Cin, Cout = w_hwio_np.shape
    band = np.zeros((KH, W * Cin, W * Cout), dtype=np.float32)
    for kw in range(KW):
        for wo in range(W):
            wi = wo + kw - 1
            if 0 <= wi < W:
                band[:, wi * Cin:(wi + 1) * Cin, wo * Cout:(wo + 1) * Cout] = \
                    w_hwio_np[:, kw]
    return band


def basic_block_nhwc(x_nhwc, w1_folded, w2_folded, b1, b2, *, nb=8):
    """x_nhwc: (N,H,W,Cin) f32. w*_folded: (3,3,C,C) f32 HWIO with BN scale folded.
    b1, b2: (C,) f32 BN biases. Returns (N,H,W,Cout) bf16."""
    N, H, W, Cin = x_nhwc.shape
    Cout = w1_folded.shape[-1]
    # TODO(synk): stride>1 / downsample identity path not implemented.
    assert Cin == Cout
    WCi, WCo = W * Cin, W * Cout
    assert WCi % 128 == 0 and WCo % 128 == 0, "lane-dense packing needs W*C % 128 == 0"

    NB = min(nb, N)
    while N % NB:
        NB -= 1
    Hp2 = H + 2
    R = NB * Hp2

    band1 = jnp.asarray(make_band(np.asarray(w1_folded), W), dtype=jnp.bfloat16)
    band2 = jnp.asarray(make_band(np.asarray(w2_folded), W), dtype=jnp.bfloat16)
    b1t = jnp.tile(b1.astype(jnp.float32), W).reshape(1, WCo)
    b2t = jnp.tile(b2.astype(jnp.float32), W).reshape(1, WCo)

    # Lane-dense packing: (W, Cin) flattened into lanes; per-image zero halo
    # rows for the height pad; all images stacked into one (N*(H+2), WCi) slab.
    x_rows = jnp.pad(x_nhwc.astype(jnp.bfloat16).reshape(N, H, WCi),
                     ((0, 0), (1, 1), (0, 0))).reshape(N * Hp2, WCi)

    kernel = functools.partial(basic_block_kernel, nb=NB, h=H)

    out2d = pl.pallas_call(
        kernel,
        out_shape=jax.ShapeDtypeStruct((N * H, WCo), jnp.bfloat16),
        grid=(N // NB,),
        in_specs=[
            pl.BlockSpec((R, WCi), lambda i: (i, 0)),
            pl.BlockSpec((3, WCi, WCo), lambda i: (0, 0, 0)),
            pl.BlockSpec((3, WCo, WCo), lambda i: (0, 0, 0)),
            pl.BlockSpec((1, WCo), lambda i: (0, 0)),
            pl.BlockSpec((1, WCo), lambda i: (0, 0)),
        ],
        out_specs=pl.BlockSpec((NB * H, WCo), lambda i: (i, 0)),
        scratch_shapes=[pltpu.VMEM((R, WCo), jnp.bfloat16)],
        compiler_params=pltpu.CompilerParams(
            dimension_semantics=("parallel",)),
    )(x_rows, band1, band2, b1t, b2t)

    return out2d.reshape(N, H, W, Cout)


def reference_nhwc(x_nhwc, w1_folded, w2_folded, b1, b2):
    """Same math (BN folded, bf16 operands, f32 accumulation) via lax.conv."""
    xb = x_nhwc.astype(jnp.bfloat16)

    def conv(x, w):
        return jax.lax.conv_general_dilated(
            x, w.astype(jnp.bfloat16), window_strides=(1, 1), padding="SAME",
            dimension_numbers=("NHWC", "HWIO", "NHWC"),
            preferred_element_type=jnp.float32)

    y = jnp.maximum(conv(xb, w1_folded) + b1, 0.0)
    y = conv(y.astype(jnp.bfloat16), w2_folded) + b2 + xb.astype(jnp.float32)
    return jnp.maximum(y, 0.0)


if __name__ == "__main__":
    key = jax.random.PRNGKey(0)
    ks = jax.random.split(key, 12)

    # BasicBlock(in_channel=8, out_channel=8); W*C = 128 (lane-dense).
    # N=16, NB=8 images per grid step -> matmul M ~ 142, grid = 2 (even).
    N, C, H, W = 16, 8, 16, 16          # NCHW, like PyTorch
    Cin = Cout = C
    eps = 1e-5

    x_nchw = jax.random.normal(ks[0], (N, C, H, W), jnp.float32)

    w1 = jax.random.normal(ks[1], (3, 3, Cin, Cout), jnp.float32) * 0.1
    w2 = jax.random.normal(ks[2], (3, 3, Cout, Cout), jnp.float32) * 0.1

    gamma1 = jax.random.uniform(ks[3], (Cout,), minval=0.5, maxval=1.5)
    beta1 = jax.random.normal(ks[4], (Cout,)) * 0.1
    mean1 = jax.random.normal(ks[5], (Cout,)) * 0.1
    var1 = jax.random.uniform(ks[6], (Cout,), minval=0.5, maxval=1.5)

    gamma2 = jax.random.uniform(ks[7], (Cout,), minval=0.5, maxval=1.5)
    beta2 = jax.random.normal(ks[8], (Cout,)) * 0.1
    mean2 = jax.random.normal(ks[9], (Cout,)) * 0.1
    var2 = jax.random.uniform(ks[10], (Cout,), minval=0.5, maxval=1.5)

    # Fold BatchNorm (inference) into conv-weight scale + per-channel bias.
    s1 = gamma1 / jnp.sqrt(var1 + eps)
    b1 = beta1 - mean1 * s1
    s2 = gamma2 / jnp.sqrt(var2 + eps)
    b2 = beta2 - mean2 * s2
    w1f = w1 * s1       # scale along Cout (last dim)
    w2f = w2 * s2

    x_nhwc = jnp.transpose(x_nchw, (0, 2, 3, 1))

    out_nhwc = basic_block_nhwc(x_nhwc, w1f, w2f, b1, b2, nb=8)
    out_nchw = jnp.transpose(out_nhwc.astype(jnp.float32), (0, 3, 1, 2))
    jax.block_until_ready(out_nchw)

    ref_nhwc = reference_nhwc(x_nhwc, w1f, w2f, b1, b2)
    ref_bf16 = ref_nhwc.astype(jnp.bfloat16).astype(jnp.float32)
    ref_nchw = jnp.transpose(ref_bf16, (0, 3, 1, 2))

    assert out_nchw.shape == (N, C, H, W)
    max_err = float(jnp.max(jnp.abs(out_nchw - ref_nchw)))
    assert jnp.allclose(out_nchw, ref_nchw, rtol=5e-2, atol=5e-2), max_err

    print("KERNEL_OK")
</pallas_src>

<mosaic_0001>
module attributes {stable_mosaic.version = 11 : i64} {
  func.func @basic_block_kernel(%arg0: i32, %arg1: memref<144x128xbf16, #tpu.memory_space<vmem>>, %arg2: memref<3x128x128xbf16, #tpu.memory_space<vmem>>, %arg3: memref<3x128x128xbf16, #tpu.memory_space<vmem>>, %arg4: memref<1x128xf32, #tpu.memory_space<vmem>>, %arg5: memref<1x128xf32, #tpu.memory_space<vmem>>, %arg6: memref<128x128xbf16, #tpu.memory_space<vmem>>, %arg7: memref<144x128xbf16, #tpu.memory_space<vmem>>) attributes {dimension_semantics = [#tpu.dimension_semantics<parallel>], iteration_bounds = array<i64: 2>, scalar_prefetch = 0 : i64, scratch_operands = 1 : i64, tpu.core_type = #tpu.core_type<tc>, window_params = [{transform_indices = @transform_0, window_bounds = array<i64: 144, 128>}, {pipeline_mode = #tpu.pipeline_mode<synchronous>, transform_indices = @transform_1, window_bounds = array<i64: 3, 128, 128>}, {pipeline_mode = #tpu.pipeline_mode<synchronous>, transform_indices = @transform_2, window_bounds = array<i64: 3, 128, 128>}, {pipeline_mode = #tpu.pipeline_mode<synchronous>, transform_indices = @transform_3, window_bounds = array<i64: 1, 128>}, {pipeline_mode = #tpu.pipeline_mode<synchronous>, transform_indices = @transform_4, window_bounds = array<i64: 1, 128>}, {transform_indices = @transform_5, window_bounds = array<i64: 128, 128>}]} {
    %c0 = arith.constant 0 : index
    %c0_0 = arith.constant 0 : index
    %0 = vector.load %arg1[%c0, %c0_0] : memref<144x128xbf16, #tpu.memory_space<vmem>>, vector<142x128xbf16>
    %c0_1 = arith.constant 0 : index
    %c0_2 = arith.constant 0 : index
    %c0_3 = arith.constant 0 : index
    %1 = vector.load %arg2[%c0_1, %c0_2, %c0_3] : memref<3x128x128xbf16, #tpu.memory_space<vmem>>, vector<1x128x128xbf16>
    %2 = vector.shape_cast %1 : vector<1x128x128xbf16> to vector<128x128xbf16>
    %cst = arith.constant dense<0.000000e+00> : vector<142x128xf32>
    %3 = tpu.matmul %0, %2, %cst {dimension_numbers = #tpu.dot_dimension_numbers<[1], [0], [0], [1], [0, 0, 1, 1], [], []>} : vector<142x128xbf16>, vector<128x128xbf16>, vector<142x128xf32> -> vector<142x128xf32>
    %c1 = arith.constant 1 : index
    %c0_4 = arith.constant 0 : index
    %4 = vector.load %arg1[%c1, %c0_4] : memref<144x128xbf16, #tpu.memory_space<vmem>>, vector<142x128xbf16>
    %c1_5 = arith.constant 1 : index
    %c0_6 = arith.constant 0 : index
    %c0_7 = arith.constant 0 : index
    %5 = vector.load %arg2[%c1_5, %c0_6, %c0_7] : memref<3x128x128xbf16, #tpu.memory_space<vmem>>, vector<1x128x128xbf16>
    %6 = vector.shape_cast %5 : vector<1x128x128xbf16> to vector<128x128xbf16>
    %cst_8 = arith.constant dense<0.000000e+00> : vector<142x128xf32>
    %7 = tpu.matmul %4, %6, %cst_8 {dimension_numbers = #tpu.dot_dimension_numbers<[1], [0], [0], [1], [0, 0, 1, 1], [], []>} : vector<142x128xbf16>, vector<128x128xbf16>, vector<142x128xf32> -> vector<142x128xf32>
    %8 = arith.addf %3, %7 : vector<142x128xf32>
    %c2 = arith.constant 2 : index
    %c0_9 = arith.constant 0 : index
    %9 = vector.load %arg1[%c2, %c0_9] : memref<144x128xbf16, #tpu.memory_space<vmem>>, vector<142x128xbf16>
    %c2_10 = arith.constant 2 : index
    %c0_11 = arith.constant 0 : index
    %c0_12 = arith.constant 0 : index
    %10 = vector.load %arg2[%c2_10, %c0_11, %c0_12] : memref<3x128x128xbf16, #tpu.memory_space<vmem>>, vector<1x128x128xbf16>
    %11 = vector.shape_cast %10 : vector<1x128x128xbf16> to vector<128x128xbf16>
    %cst_13 = arith.constant dense<0.000000e+00> : vector<142x128xf32>
    %12 = tpu.matmul %9, %11, %cst_13 {dimension_numbers = #tpu.dot_dimension_numbers<[1], [0], [0], [1], [0, 0, 1, 1], [], []>} : vector<142x128xbf16>, vector<128x128xbf16>, vector<142x128xf32> -> vector<142x128xf32>
    %13 = arith.addf %8, %12 : vector<142x128xf32>
    %c0_14 = arith.constant 0 : index
    %c0_15 = arith.constant 0 : index
    %14 = vector.load %arg4[%c0_14, %c0_15] : memref<1x128xf32, #tpu.memory_space<vmem>>, vector<1x128xf32>
    %15 = vector.broadcast %14 : vector<1x128xf32> to vector<142x128xf32>
    %16 = arith.addf %13, %15 : vector<142x128xf32>
    %cst_16 = arith.constant 0.000000e+00 : f32
    %17 = vector.broadcast %cst_16 : f32 to vector<142x128xf32>
    %18 = arith.maximumf %16, %17 : vector<142x128xf32>
    %19 = arith.truncf %18 : vector<142x128xf32> to vector<142x128xbf16>
    %c1_17 = arith.constant 1 : index
    %c0_18 = arith.constant 0 : index
    %20 = vector.load %arg7[%c1_17, %c0_18] : memref<144x128xbf16, #tpu.memory_space<vmem>>, vector<142x128xbf16>
    tpu.vector_store %arg7[%c1_17, %c0_18], %19 {strides = array<i32>} : memref<144x128xbf16, #tpu.memory_space<vmem>>, vector<142x128xbf16>,
    %cst_19 = arith.constant 0.000000e+00 : bf16
    %21 = vector.broadcast %cst_19 : bf16 to vector<1x128xbf16>
    %cst_20 = arith.constant 0.000000e+00 : bf16
    %22 = vector.broadcast %cst_20 : bf16 to vector<2x128xbf16>
    %c0_21 = arith.constant 0 : index
    %c0_22 = arith.constant 0 : index
    %23 = vector.load %arg7[%c0_21, %c0_22] : memref<144x128xbf16, #tpu.memory_space<vmem>>, vector<1x128xbf16>
    tpu.vector_store %arg7[%c0_21, %c0_22], %21 {strides = array<i32>} : memref<144x128xbf16, #tpu.memory_space<vmem>>, vector<1x128xbf16>,
    %c143 = arith.constant 143 : index
    %c0_23 = arith.constant 0 : index
    %24 = vector.load %arg7[%c143, %c0_23] : memref<144x128xbf16, #tpu.memory_space<vmem>>, vector<1x128xbf16>
    tpu.vector_store %arg7[%c143, %c0_23], %21 {strides = array<i32>} : memref<144x128xbf16, #tpu.memory_space<vmem>>, vector<1x128xbf16>,
    %c17 = arith.constant 17 : index
    %c0_24 = arith.constant 0 : index
    %25 = vector.load %arg7[%c17, %c0_24] : memref<144x128xbf16, #tpu.memory_space<vmem>>, vector<2x128xbf16>
    tpu.vector_store %arg7[%c17, %c0_24], %22 {strides = array<i32>} : memref<144x128xbf16, #tpu.memory_space<vmem>>, vector<2x128xbf16>,
    %c35 = arith.constant 35 : index
    %c0_25 = arith.constant 0 : index
    %26 = vector.load %arg7[%c35, %c0_25] : memref<144x128xbf16, #tpu.memory_space<vmem>>, vector<2x128xbf16>
    tpu.vector_store %arg7[%c35, %c0_25], %22 {strides = array<i32>} : memref<144x128xbf16, #tpu.memory_space<vmem>>, vector<2x128xbf16>,
    %c53 = arith.constant 53 : index
    %c0_26 = arith.constant 0 : index
    %27 = vector.load %arg7[%c53, %c0_26] : memref<144x128xbf16, #tpu.memory_space<vmem>>, vector<2x128xbf16>
    tpu.vector_store %arg7[%c53, %c0_26], %22 {strides = array<i32>} : memref<144x128xbf16, #tpu.memory_space<vmem>>, vector<2x128xbf16>,
    %c71 = arith.constant 71 : index
    %c0_27 = arith.constant 0 : index
    %28 = vector.load %arg7[%c71, %c0_27] : memref<144x128xbf16, #tpu.memory_space<vmem>>, vector<2x128xbf16>
    tpu.vector_store %arg7[%c71, %c0_27], %22 {strides = array<i32>} : memref<144x128xbf16, #tpu.memory_space<vmem>>, vector<2x128xbf16>,
    %c89 = arith.constant 89 : index
    %c0_28 = arith.constant 0 : index
    %29 = vector.load %arg7[%c89, %c0_28] : memref<144x128xbf16, #tpu.memory_space<vmem>>, vector<2x128xbf16>
    tpu.vector_store %arg7[%c89, %c0_28], %22 {strides = array<i32>} : memref<144x128xbf16, #tpu.memory_space<vmem>>, vector<2x128xbf16>,
    %c107 = arith.constant 107 : index
    %c0_29 = arith.constant 0 : index
    %30 = vector.load %arg7[%c107, %c0_29] : memref<144x128xbf16, #tpu.memory_space<vmem>>, vector<2x128xbf16>
    tpu.vector_store %arg7[%c107, %c0_29], %22 {strides = array<i32>} : memref<144x128xbf16, #tpu.memory_space<vmem>>, vector<2x128xbf16>,
    %c125 = arith.constant 125 : index
    %c0_30 = arith.constant 0 : index
    %31 = vector.load %arg7[%c125, %c0_30] : memref<144x128xbf16, #tpu.memory_space<vmem>>, vector<2x128xbf16>
    tpu.vector_store %arg7[%c125, %c0_30], %22 {strides = array<i32>} : memref<144x128xbf16, #tpu.memory_space<vmem>>, vector<2x128xbf16>,
    %c0_31 = arith.constant 0 : index
    %c0_32 = arith.constant 0 : index
    %32 = vector.load %arg7[%c0_31, %c0_32] : memref<144x128xbf16, #tpu.memory_space<vmem>>, vector<142x128xbf16>
    %c0_33 = arith.constant 0 : index
    %c0_34 = arith.constant 0 : index
    %c0_35 = arith.constant 0 : index
    %33 = vector.load %arg3[%c0_33, %c0_34, %c0_35] : memref<3x128x128xbf16, #tpu.memory_space<vmem>>, vector<1x128x128xbf16>
    %34 = vector.shape_cast %33 : vector<1x128x128xbf16> to vector<128x128xbf16>
    %cst_36 = arith.constant dense<0.000000e+00> : vector<142x128xf32>
    %35 = tpu.matmul %32, %34, %cst_36 {dimension_numbers = #tpu.dot_dimension_numbers<[1], [0], [0], [1], [0, 0, 1, 1], [], []>} : vector<142x128xbf16>, vector<128x128xbf16>, vector<142x128xf32> -> vector<142x128xf32>
    %c1_37 = arith.constant 1 : index
    %c0_38 = arith.constant 0 : index
    %36 = vector.load %arg7[%c1_37, %c0_38] : memref<144x128xbf16, #tpu.memory_space<vmem>>, vector<142x128xbf16>
    %c1_39 = arith.constant 1 : index
    %c0_40 = arith.constant 0 : index
    %c0_41 = arith.constant 0 : index
    %37 = vector.load %arg3[%c1_39, %c0_40, %c0_41] : memref<3x128x128xbf16, #tpu.memory_space<vmem>>, vector<1x128x128xbf16>
    %38 = vector.shape_cast %37 : vector<1x128x128xbf16> to vector<128x128xbf16>
    %cst_42 = arith.constant dense<0.000000e+00> : vector<142x128xf32>
    %39 = tpu.matmul %36, %38, %cst_42 {dimension_numbers = #tpu.dot_dimension_numbers<[1], [0], [0], [1], [0, 0, 1, 1], [], []>} : vector<142x128xbf16>, vector<128x128xbf16>, vector<142x128xf32> -> vector<142x128xf32>
    %40 = arith.addf %35, %39 : vector<142x128xf32>
    %c2_43 = arith.constant 2 : index
    %c0_44 = arith.constant 0 : index
    %41 = vector.load %arg7[%c2_43, %c0_44] : memref<144x128xbf16, #tpu.memory_space<vmem>>, vector<142x128xbf16>
    %c2_45 = arith.constant 2 : index
    %c0_46 = arith.constant 0 : index
    %c0_47 = arith.constant 0 : index
    %42 = vector.load %arg3[%c2_45, %c0_46, %c0_47] : memref<3x128x128xbf16, #tpu.memory_space<vmem>>, vector<1x128x128xbf16>
    %43 = vector.shape_cast %42 : vector<1x128x128xbf16> to vector<128x128xbf16>
    %cst_48 = arith.constant dense<0.000000e+00> : vector<142x128xf32>
    %44 = tpu.matmul %41, %43, %cst_48 {dimension_numbers = #tpu.dot_dimension_numbers<[1], [0], [0], [1], [0, 0, 1, 1], [], []>} : vector<142x128xbf16>, vector<128x128xbf16>, vector<142x128xf32> -> vector<142x128xf32>
    %45 = arith.addf %40, %44 : vector<142x128xf32>
    %c0_49 = arith.constant 0 : index
    %c0_50 = arith.constant 0 : index
    %46 = vector.load %arg5[%c0_49, %c0_50] : memref<1x128xf32, #tpu.memory_space<vmem>>, vector<1x128xf32>
    %47 = vector.broadcast %46 : vector<1x128xf32> to vector<142x128xf32>
    %48 = arith.addf %45, %47 : vector<142x128xf32>
    %c1_51 = arith.constant 1 : index
    %c0_52 = arith.constant 0 : index
    %49 = vector.load %arg1[%c1_51, %c0_52] : memref<144x128xbf16, #tpu.memory_space<vmem>>, vector<142x128xbf16>
    %50 = arith.extf %49 : vector<142x128xbf16> to vector<142x128xf32>
    %51 = arith.addf %48, %50 : vector<142x128xf32>
    %cst_53 = arith.constant 0.000000e+00 : f32
    %52 = vector.broadcast %cst_53 : f32 to vector<142x128xf32>
    %53 = arith.maximumf %51, %52 : vector<142x128xf32>
    %54 = arith.truncf %53 : vector<142x128xf32> to vector<142x128xbf16>
    %c0_54 = arith.constant 0 : index
    %c0_55 = arith.constant 0 : index
    %55 = vector.load %arg7[%c0_54, %c0_55] : memref<144x128xbf16, #tpu.memory_space<vmem>>, vector<142x128xbf16>
    tpu.vector_store %arg7[%c0_54, %c0_55], %54 {strides = array<i32>} : memref<144x128xbf16, #tpu.memory_space<vmem>>, vector<142x128xbf16>,
    %c0_56 = arith.constant 0 : index
    %c0_57 = arith.constant 0 : index
    %56 = vector.load %arg7[%c0_56, %c0_57] : memref<144x128xbf16, #tpu.memory_space<vmem>>, vector<16x128xbf16>
    %c0_58 = arith.constant 0 : index
    %c0_59 = arith.constant 0 : index
    %57 = vector.load %arg6[%c0_58, %c0_59] : memref<128x128xbf16, #tpu.memory_space<vmem>>, vector<16x128xbf16>
    tpu.vector_store %arg6[%c0_58, %c0_59], %56 {strides = array<i32>} : memref<128x128xbf16, #tpu.memory_space<vmem>>, vector<16x128xbf16>,
    %c18 = arith.constant 18 : index
    %c0_60 = arith.constant 0 : index
    %58 = vector.load %arg7[%c18, %c0_60] : memref<144x128xbf16, #tpu.memory_space<vmem>>, vector<16x128xbf16>
    %c16 = arith.constant 16 : index
    %c0_61 = arith.constant 0 : index
    %59 = vector.load %arg6[%c16, %c0_61] : memref<128x128xbf16, #tpu.memory_space<vmem>>, vector<16x128xbf16>
    tpu.vector_store %arg6[%c16, %c0_61], %58 {strides = array<i32>} : memref<128x128xbf16, #tpu.memory_space<vmem>>, vector<16x128xbf16>,
    %c36 = arith.constant 36 : index
    %c0_62 = arith.constant 0 : index
    %60 = vector.load %arg7[%c36, %c0_62] : memref<144x128xbf16, #tpu.memory_space<vmem>>, vector<16x128xbf16>
    %c32 = arith.constant 32 : index
    %c0_63 = arith.constant 0 : index
    %61 = vector.load %arg6[%c32, %c0_63] : memref<128x128xbf16, #tpu.memory_space<vmem>>, vector<16x128xbf16>
    tpu.vector_store %arg6[%c32, %c0_63], %60 {strides = array<i32>} : memref<128x128xbf16, #tpu.memory_space<vmem>>, vector<16x128xbf16>,
    %c54 = arith.constant 54 : index
    %c0_64 = arith.constant 0 : index
    %62 = vector.load %arg7[%c54, %c0_64] : memref<144x128xbf16, #tpu.memory_space<vmem>>, vector<16x128xbf16>
    %c48 = arith.constant 48 : index
    %c0_65 = arith.constant 0 : index
    %63 = vector.load %arg6[%c48, %c0_65] : memref<128x128xbf16, #tpu.memory_space<vmem>>, vector<16x128xbf16>
    tpu.vector_store %arg6[%c48, %c0_65], %62 {strides = array<i32>} : memref<128x128xbf16, #tpu.memory_space<vmem>>, vector<16x128xbf16>,
    %c72 = arith.constant 72 : index
    %c0_66 = arith.constant 0 : index
    %64 = vector.load %arg7[%c72, %c0_66] : memref<144x128xbf16, #tpu.memory_space<vmem>>, vector<16x128xbf16>
    %c64 = arith.constant 64 : index
    %c0_67 = arith.constant 0 : index
    %65 = vector.load %arg6[%c64, %c0_67] : memref<128x128xbf16, #tpu.memory_space<vmem>>, vector<16x128xbf16>
    tpu.vector_store %arg6[%c64, %c0_67], %64 {strides = array<i32>} : memref<128x128xbf16, #tpu.memory_space<vmem>>, vector<16x128xbf16>,
    %c90 = arith.constant 90 : index
    %c0_68 = arith.constant 0 : index
    %66 = vector.load %arg7[%c90, %c0_68] : memref<144x128xbf16, #tpu.memory_space<vmem>>, vector<16x128xbf16>
    %c80 = arith.constant 80 : index
    %c0_69 = arith.constant 0 : index
    %67 = vector.load %arg6[%c80, %c0_69] : memref<128x128xbf16, #tpu.memory_space<vmem>>, vector<16x128xbf16>
    tpu.vector_store %arg6[%c80, %c0_69], %66 {strides = array<i32>} : memref<128x128xbf16, #tpu.memory_space<vmem>>, vector<16x128xbf16>,
    %c108 = arith.constant 108 : index
    %c0_70 = arith.constant 0 : index
    %68 = vector.load %arg7[%c108, %c0_70] : memref<144x128xbf16, #tpu.memory_space<vmem>>, vector<16x128xbf16>
    %c96 = arith.constant 96 : index
    %c0_71 = arith.constant 0 : index
    %69 = vector.load %arg6[%c96, %c0_71] : memref<128x128xbf16, #tpu.memory_space<vmem>>, vector<16x128xbf16>
    tpu.vector_store %arg6[%c96, %c0_71], %68 {strides = array<i32>} : memref<128x128xbf16, #tpu.memory_space<vmem>>, vector<16x128xbf16>,
    %c126 = arith.constant 126 : index
    %c0_72 = arith.constant 0 : index
    %70 = vector.load %arg7[%c126, %c0_72] : memref<144x128xbf16, #tpu.memory_space<vmem>>, vector<16x128xbf16>
    %c112 = arith.constant 112 : index
    %c0_73 = arith.constant 0 : index
    %71 = vector.load %arg6[%c112, %c0_73] : memref<128x128xbf16, #tpu.memory_space<vmem>>, vector<16x128xbf16>
    tpu.vector_store %arg6[%c112, %c0_73], %70 {strides = array<i32>} : memref<128x128xbf16, #tpu.memory_space<vmem>>, vector<16x128xbf16>,
    return
  }
  func.func @transform_0(%arg0: i32) -> (i32, i32) {
    %c0_i32 = arith.constant 0 : i32
    %c0_i32_0 = arith.constant 0 : i32
    return %arg0, %c0_i32 : i32, i32
  }
  func.func @transform_1(%arg0: i32) -> (i32, i32, i32) {
    %c0_i32 = arith.constant 0 : i32
    %c0_i32_0 = arith.constant 0 : i32
    %c0_i32_1 = arith.constant 0 : i32
    %c0_i32_2 = arith.constant 0 : i32
    return %c0_i32, %c0_i32_0, %c0_i32_1 : i32, i32, i32
  }
  func.func @transform_2(%arg0: i32) -> (i32, i32, i32) {
    %c0_i32 = arith.constant 0 : i32
    %c0_i32_0 = arith.constant 0 : i32
    %c0_i32_1 = arith.constant 0 : i32
    %c0_i32_2 = arith.constant 0 : i32
    return %c0_i32, %c0_i32_0, %c0_i32_1 : i32, i32, i32
  }
  func.func @transform_3(%arg0: i32) -> (i32, i32) {
    %c0_i32 = arith.constant 0 : i32
    %c0_i32_0 = arith.constant 0 : i32
    %c0_i32_1 = arith.constant 0 : i32
    return %c0_i32, %c0_i32_0 : i32, i32
  }
  func.func @transform_4(%arg0: i32) -> (i32, i32) {
    %c0_i32 = arith.constant 0 : i32
    %c0_i32_0 = arith.constant 0 : i32
    %c0_i32_1 = arith.constant 0 : i32
    return %c0_i32, %c0_i32_0 : i32, i32
  }
  func.func @transform_5(%arg0: i32) -> (i32, i32) {
    %c0_i32 = arith.constant 0 : i32
    %c0_i32_0 = arith.constant 0 : i32
    return %arg0, %c0_i32 : i32, i32
  }
}

</mosaic_0001>

<bundles_post_ra>
// kernel: tpu_custom_call.1
= control target key start
LH: loop header
LB: loop body
LE: loop exit
PB: predicated region body
PF: predicated region fallthrough
CT: control target
= control target key end

     0   :  { %s3364_s0 = inlined_call_operand.hbm [shape: bf16[288,128], index: 0, kind: input, shape index: {}]   ;;  %s3365_s1 = inlined_call_operand.hbm [shape: bf16[3,128,128], index: 1, kind: input, shape index: {}]   ;;  %s3366_s2 = inlined_call_operand.hbm [shape: bf16[3,128,128], index: 2, kind: input, shape index: {}]   ;;  %s3367_s3 = inlined_call_operand.vmem [shape: f32[1,128], index: 3, kind: input, shape index: {}]   ;;  %s3368_s4 = inlined_call_operand.vmem [shape: f32[1,128], index: 4, kind: input, shape index: {}]   ;;  %s3369_s5 = inlined_call_operand.hbm [shape: bf16[256,128], index: 5, kind: output, shape index: {}]  }
   0x1   :  { %3372 = sst [smem:[#allocation13_spill]] %s3365_s1 }
   0x2   :  { %10 = vsyncpa [#allocation4], 0 }
   0x3   :  { %12 = vsyncpa [#allocation4 + $0x1], 0 }
   0x4   :  { %13 = vsyncpa [#allocation7], 0 }
   0x5   :  { %14 = vsyncpa [#allocation5], 0 }
   0x6   :  { %16 = vsyncpa [#allocation5 + $0x1], 0  ;;  %s2877_s18 = smov 0   ;;  %s2879_s19 = smov 0  }
   0x7   :  { %s2881_s20 = smov 0   ;;  %s2883_s21 = smov 0  }
   0x8 LB: > { %s2898_s22 = sadd.s32 4294967295, %s2839_s21   ;;  %s2140_s23 = sadd.s32 4294967294, %s2839_s21   ;;  %s2839_s21 = sphi %s2883_s21, %s3403_s21   ;;  %s2835_s20 = sphi %s2881_s20, %s3402_s20   ;;  %s2831_s19 = sphi %s2879_s19, %s3401_s19   ;;  %s2827_s18 = sphi %s2877_s18, %s3400_s18  }
   0x9   : > { %p42_p0 = scmp.ne.s32.totalorder %s2831_s19, %s2827_s18  ;;  %p43_p1 = scmp.eq.s32.totalorder %s2898_s22, 0 }
   0xa   : > { %p150_p2 = scmp.eq.s32.totalorder %s2898_s22, 1  ;;  %p156_p3 = scmp.eq.s32.totalorder %s2140_s23, 1 }
   0xb   : > { %p2907_p4 = por %p43_p1, %p42_p0  ;;  %p2141_p5 = scmp.ge.s32.totalorder %s2839_s21, 1 }
   0xc   : > { %p2912_p6 = por %p156_p3, %p42_p0  ;;  %p163_p7 = scmp.lt.s32.totalorder %s2839_s21, 3 }
   0xd   : > { %s3375_s1 = sld [smem:[#allocation13_spill]]  ;;  %s2841_s30 = smov [#allocation6]  }
   0xe   : > { %p2920_p8 = pnand %p2141_p5, %p163_p7  ;;  %s176_s6 = sshll.u32 %s2841_s30, 4  ;;  %s177_s6 = int_to_ptr.vmem [resolvable:$true] %s176_s6 }
   0xf   : > { %s188_s9 = sshll.u32 %s3366_s2, 4  ;;  %s3370_s10 = smov 64   ;;  %s189_s9 = int_to_ptr.hbm [resolvable:$true] %s188_s9 }
  0x10   : > { %p2608_p9 = pneg %p2920_p8  ;;  %s3371_s11 = smov 4  }
  0x11   : > { %s2844_s12 = smov [#allocation8]   ;;  %s2939_s14 = sadd.s32 1, %s2839_s21  }
  0x12   : > { %p2609_p10 = pnand %p2608_p9, %p43_p1  ;;  %s190_s13 = sshll.u32 %s2844_s12, 4  ;;  %s191_s13 = int_to_ptr.vmem [resolvable:$true] %s190_s13 }
  0x13   : > { %s174_s28 = sshll.u32 %s3375_s1, 4  ;;  %s29_s15 = sadd.s32 1, %s2835_s20  ;;  %s175_s28 = int_to_ptr.hbm [resolvable:$true] %s174_s28 }
  0x14   : > { %2611 = dma.hbm_to_vmem [thread:$0]  (!%p2609_p10), %s175_s28, 3072, %s177_s6, [#allocation7], %s3370_s10, %s3370_s10, %s3371_s11  }
  0x15   : > { %2614 = dma.hbm_to_vmem [thread:$0]  (!%p2609_p10), %s189_s9, 3072, %s191_s13, [#allocation7], %s3370_s10, %s3370_s10, %s3371_s11  }
  0x16   : > { %s26_s16 = ssub.s32 %s2839_s21, %s2939_s14  ;;  %p36_p12 = scmp.ne.s32.totalorder %s2835_s20, %s2831_s19 }
  0x17   : > { %p27_p13 = scmp.eq.s32.totalorder %s26_s16, 0  ;;  %p37_p0 = scmp.eq.s32.totalorder %s2839_s21, 0 }
  0x18   : > { %p2949_p3 = por %p150_p2, %p36_p12  ;;  %p2625_p5 = scmp.lt.s32.totalorder %s2839_s21, 2 }
  0x19   : > { %s2955_s23 = scalar_select %p27_p13, %s2835_s20, %s29_s15  }
  0x1a   : > { %p38_p7 = por %p37_p0, %p36_p12  ;;  %s210_s26 = sand.u32 1, %s2835_s20  }
  0x1b   : > { %s2594_s27 = smul.u32 72, %s210_s26  ;;  %s211_s15 = scalar_lea.sflag [#allocation4], %s210_s26 }
  0x1c   : > { %s2409_s28 = smul.u32 72, %s2839_s21  ;;  %p2959_p9 = pnand %p2625_p5, %p38_p7 }
  0x1d   : > { %s214_s9 = scalar_lea.vmem [#allocation3], %s2594_s27  ;;  %s2744_s6 = scalar_lea.hbm %s3364_s0, 144 }
  0x1e   : > { %s219_s8 = scalar_lea.hbm %s3364_s0, %s2409_s28  ;;  %s222_s12 = sshll.u32 %s214_s9, 4  ;;  %s223_s12 = int_to_ptr.vmem [resolvable:$true] %s222_s12 }
  0x1f   : > { %s220_s13 = sshll.u32 %s219_s8, 4  ;;  %p2741_p10 = pneg %p2959_p9  ;;  %s221_s13 = int_to_ptr.hbm [resolvable:$true] %s220_s13 }
  0x20   : > { %s2737_s16 = sshra.s32 %s221_s13, 4  ;;  %s2738_s16 = int_to_ptr.hbm [resolvable:$true] %s2737_s16 }
  0x21   : > { %s2739_s10 = scalar_lea.hbm %s2738_s16, 72  ;;  %p2745_p0 = scmp.lt.s32.totalorder %s2738_s16, %s3364_s0 }
  0x22   : > { %p2740_p2 = scmp.ne.s32.totalorder %s2738_s16, %s2739_s10  ;;  %p2746_p5 = scmp.lt.s32.totalorder %s2744_s6, %s2739_s10 }
  0x24   : > { %p2742_p12 = pnand %p2741_p10, %p2740_p2  ;;  %p2747_p7 = por %p2746_p5, %p2745_p0 }
  0x26   : > { %p2743_p13 = pneg %p2742_p12 }
  0x28   : > { %p2748_p11 = pnand %p2747_p7, %p2743_p13 }
  0x2a   : > { %2751 = shalt.err (!%p2748_p11)
}
  0x2b   : > { %s3379_s26 = smov 4   ;;  %s3380_s27 = smov 64  }
  0x2c   : > { %2618 = dma.hbm_to_vmem [thread:$0]  (!%p2959_p9), %s221_s13, 1152, %s223_s12, %s211_s15, %s3380_s27, %s3380_s27, %s3379_s26  }
  0x2d   : > { %234 = sbr.rel (%p2920_p8) target bundleno = 638 (0x27e), region = 40  ;;  %s2982_s1 = sand.u32 (!%p2920_p8), 1, %s2831_s19  }
  0x2e   : > { %s2595_s11 = smul.u32 (!%p2920_p8), 72, %s2982_s1  ;;  %s237_s10 = scalar_lea.sflag (!%p2920_p8), [#allocation4], %s2982_s1 }
  0x30   : > { %s2986_s8 = scalar_lea.vmem (!%p2920_p8), [#allocation3], %s2595_s11 }
  0x32   : > { %2812 = dma.done.wait (%p2907_p4), %s237_s10, 1152  }
  0x33   : > { %2814 = vsyncadd (%p2907_p4), %s237_s10, 4294966144 }
  0x34   : > { %2816 = dma.done.wait (%p43_p1), [#allocation7], 6144  }
  0x35   : > { %2818 = vsyncadd (%p43_p1), [#allocation7], 4294961152  ;;  %v2432_v0 = vld [vmem:[#allocation6 + $0x78] sm:$0xff]  ;;  %v2431_v2 = vld [vmem:[#allocation6 + $0x70] sm:$0xff]  ;;  %vm378_vm0 = vsmask.f32 7424 }
  0x36   : > { %v2424_v1 = vld [vmem:[#allocation6 + $0x38] sm:$0xff]  ;;  %2578 = vmatpush.bf16.msra.mxu2 %v2432_v0  ;;  %v2423_v3 = vld [vmem:[#allocation6 + $0x30] sm:$0xff]  ;;  %507 = vmatpush.bf16.msra.mxu0 %v2432_v0  ;;  %v2430_v4 = vld [vmem:[#allocation6 + $0x68] sm:$0xff]  ;;  %vm696_vm1 = vcmask 1046528   ;;  %vm1082_vm2 = vcmask 1043456   ;;  %vm1109_vm7 = vcmask 1040384  }
  0x37   : > { %2586 = vmatpush.bf16.msra.mxu3 %v2424_v1  ;;  %621 = vmatpush.bf16.msra.mxu1 %v2424_v1  ;;  %v2422_v5 = vld [vmem:[#allocation6 + $0x28] sm:$0xff]  ;;  %v2429_v6 = vld [vmem:[#allocation6 + $0x60] sm:$0xff]  ;;  %v2428_v8 = vld [vmem:[#allocation6 + $0x58] sm:$0xff]  ;;  %vm1083_vm3 = vsmask.f32 7938  ;;  %vm1120_vm10 = vcmask 1041408  }
  0x38   : > { %v2421_v7 = vld [vmem:[#allocation6 + $0x20] sm:$0xff]  ;;  %v2420_v9 = vld [vmem:[#allocation6 + $0x18] sm:$0xff]  ;;  %v2427_v11 = vld [vmem:[#allocation6 + $0x50] sm:$0xff]  ;;  %vm901_vm5 = vsmask.f32 256  ;;  %vm1126_vm13 = vcmask 1042433  }
  0x39   : > { %v2997_v10 = vld [vmem:[%s2986_s8 + $0x28] sm:$0xff]  ;;  %v2419_v12 = vld [vmem:[#allocation6 + $0x10] sm:$0xff]  ;;  %v3000_v13 = vld [vmem:[%s2986_s8 + $0x30] sm:$0xff]  ;;  %vm902_vm6 = vsmask.f32 4368  ;;  %s2149_s12 = sshll.u32 %s2982_s1, 6 }
  0x3a   : > { %2579 = vmatpush.bf16.msra.mxu2 %v2431_v2  ;;  %508 = vmatpush.bf16.msra.mxu0 %v2431_v2  ;;  %v419_v14 = vshll.u32 %v2997_v10, 16  ;;  %v2426_v15 = vld [vmem:[#allocation6 + $0x48] sm:$0xff]  ;;  %v423_v18 = vshrl.u32 %v2997_v10, 16  ;;  %v427_v19 = vshll.u32 %v3000_v13, 16  ;;  %v2425_v20 = vld [vmem:[#allocation6 + $0x40] sm:$0xff]  ;;  %v2440_v24 = vld [vmem:[#allocation6 + $0xb8] sm:$0xff] }
  0x3b   : > { %2587 = vmatpush.bf16.msra.mxu3 %v2423_v3  ;;  %622 = vmatpush.bf16.msra.mxu1 %v2423_v3  ;;  %v2418_v16 = vld [vmem:[#allocation6 + $0x8] sm:$0xff]  ;;  %v2417_v21 = vld [vmem:[#allocation6] sm:$0xff]  ;;  %v2439_v26 = vld [vmem:[#allocation6 + $0xb0] sm:$0xff]  ;;  %v431_v29 = vshrl.u32 %v3000_v13, 16  ;;  %vm1121_vm11 = vsmask.f32 1282 }
  0x3c   : > { %v3003_v17 = vrot.slane %v419_v14, 1  ;;  %v429_v23 = vrot.slane %v427_v19, 1  ;;  %v3011_v27 = vld [vmem:[%s2986_s8 + $0x38] sm:$0xff]  ;;  %v2437_v31 = vld [vmem:[#allocation6 + $0xa0] sm:$0xff]  ;;  %v3016_v34 = vld [vmem:[%s2986_s8 + $0x40] sm:$0xff]   ;;  %s3241_s13 = scalar_lea.vmem [#allocation9], %s2149_s12 }
  0x3d   : > { %v2438_v28 = vld [vmem:[#allocation6 + $0xa8] sm:$0xff]  ;;  %v435_v30 = vshll.u32 %v3011_v27, 16  ;;  %v2671_v35 = vld [vmem:[%s2986_s8 + $0x40] sm:$0xf]   ;;  %v3023_v40 = vld [vmem:[%s2986_s8 + $0x8] sm:$0xff]  ;;  %v439_v46 = vshrl.u32 %v3011_v27, 16 }
  0x3e   : > { %2580 = vmatpush.bf16.msra.mxu2 %v2430_v4  ;;  %509 = vmatpush.bf16.msra.mxu0 %v2430_v4  ;;  %v425_v22 = vor.u32 %v423_v18, %v3003_v17  ;;  %v433_v32 = vor.u32 %v431_v29, %v429_v23  ;;  %v2436_v36 = vld [vmem:[#allocation6 + $0x98] sm:$0xff]  ;;  %v2435_v38 = vld [vmem:[#allocation6 + $0x90] sm:$0xff]  ;;  %v2434_v43 = vld [vmem:[#allocation6 + $0x88] sm:$0xff]  ;;  %v387_v45 = vshll.u32 %v3023_v40, 16  ;;  %v443_v47 = vshll.u32 %v3016_v34, 16  ;;  %s2472_s15 = sshll.u32 %s2898_s22, 6 }
  0x3f   : > { %2588 = vmatpush.bf16.msra.mxu3 %v2422_v5  ;;  %623 = vmatpush.bf16.msra.mxu1 %v2422_v5  ;;  %v437_v33 = vrot.slane %v435_v30, 1  ;;  %v2474_v39 = vld [vmem:[%s2986_s8] sm:$0xff]   ;;  %v2433_v50 = vld [vmem:[#allocation6 + $0x80] sm:$0xff]  ;;  %v391_v56 = vshrl.u32 %v3023_v40, 16  ;;  %v447_v62 = vshrl.u32 %v3016_v34, 16  ;;  %v2412_v1 = vld [vmem:[%s2986_s8 + $0x18] sm:$0xff]  ;;  %s2044_s7 = scalar_lea.hbm %s3369_s5, %s2472_s15 }
  0x40   : > { %v430_v25 = vsel %vm378_vm0, %v425_v22, %v429_v23  ;;  %v380_v41 = vshrl.u32 %v2474_v39, 16  ;;  %v382_v42 = vshll.u32 %v2474_v39, 16  ;;  %v389_v49 = vrot.slane %v387_v45, 1  ;;  %v2411_v55 = vld [vmem:[%s2986_s8 + $0x10] sm:$0xff]  ;;  %v2823_v60 = vld [vmem:[%s2986_s8 + $0x40] sm:$0x70]  ;;  %vm1084_vm4 = vmand %vm1082_vm2, %vm1083_vm3 }
  0x41   : > { %v438_v37 = vsel %vm378_vm0, %v433_v32, %v437_v33  ;;  %v441_v52 = vor.u32 %v439_v46, %v437_v33  ;;  %v445_v53 = vrot.slane %v443_v47, 1  ;;  %v395_v58 = vshll.u32 %v2411_v55, 16  ;;  %v2557_v3 = vld [vmem:[%s2986_s8] sm:$0xf0]  ;;  %v2558_v4 = vld [vmem:[%s2986_s8] sm:$0xe]  ;;  %vm3084_vm8 = vmor %vm901_vm5, %vm902_vm6 }
  0x42   : > { %2581 = vmatpush.bf16.msra.mxu2 %v2429_v6  ;;  %510 = vmatpush.bf16.msra.mxu0 %v2429_v6  ;;  %v384_v44 = vrot.slane %v382_v42, 1  ;;  %v393_v57 = vor.u32 %v391_v56, %v389_v49  ;;  %v2672_v0 = vor.u32 %v2823_v60, %v2671_v35  ;;  %v399_v2 = vshrl.u32 %v2411_v55, 16  ;;  %v2453_v46 = vld [vmem:[#allocation8 + $0x28] sm:$0xff]  ;;  %v2470_v56 = vld [vmem:[#allocation8 + $0xb0] sm:$0xff]  ;;  %v2448_v60 = vld [vmem:[#allocation8] sm:$0xff]  ;;  %s2045_s28 = sshll.u32 %s3241_s13, 4  ;;  %s2046_s28 = int_to_ptr.vmem [resolvable:$true] %s2045_s28 }
  0x43   : > { %2589 = vmatpush.bf16.msra.mxu3 %v2421_v7  ;;  %624 = vmatpush.bf16.msra.mxu1 %v2421_v7  ;;  %v446_v54 = vsel %vm378_vm0, %v441_v52, %v445_v53  ;;  %v397_v59 = vrot.slane %v395_v58, 1  ;;  %v449_v63 = vor.u32 %v447_v62, %v445_v53  ;;  %v403_v6 = vshll.u32 %v2412_v1, 16  ;;  %v2462_v58 = vld [vmem:[#allocation8 + $0x70] sm:$0xff]  ;;  %vm3090_vm9 = vmand %vm1109_vm7, %vm901_vm5  ;;  %s2047_s26 = sshll.u32 %s2044_s7, 4  ;;  %s2033_s22 = scalar_lea.sflag [#allocation5], %s2982_s1  ;;  %s2048_s26 = int_to_ptr.hbm [resolvable:$true] %s2047_s26 }
  0x44   : > { %v385_v48 = vor.u32 %v384_v44, %v380_v41  ;;  %v700_v22 = vrot.slane %v2411_v55, 1  ;;  %v706_v32 = vrot.slane %v2997_v10, 1  ;;  %v2455_v41 = vld [vmem:[#allocation8 + $0x38] sm:$0xff]  ;;  %v712_v44 = vrot.slane %v3016_v34, 1  ;;  %vm3103_vm12 = vmand %vm1120_vm10, %vm1121_vm11  ;;  %s2781_s27 = sshra.s32 %s2048_s26, 4  ;;  %s2787_s24 = scalar_lea.hbm %s3369_s5, 128  ;;  %s2782_s27 = int_to_ptr.hbm [resolvable:$true] %s2781_s27 }
  0x45   : > { %v398_v61 = vsel %vm378_vm0, %v393_v57, %v397_v59  ;;  %v401_v5 = vor.u32 %v399_v2, %v397_v59  ;;  %v405_v7 = vrot.slane %v403_v6, 1  ;;  %v2463_v34 = vld [vmem:[#allocation8 + $0x78] sm:$0xff]  ;;  %v2449_v57 = vld [vmem:[#allocation8 + $0x8] sm:$0xff]  ;;  %vm1127_vm14 = vsmask.f32 2310  ;;  %s2783_s11 = scalar_lea.hbm %s2782_s27, 64  ;;  %p2788_p11 = scmp.lt.s32.totalorder %s2782_s27, %s3369_s5 }
  0x46   : > { %2582 = vmatpush.bf16.msra.mxu2 %v2428_v8  ;;  %511 = vmatpush.bf16.msra.mxu0 %v2428_v8  ;;  %v390_v51 = vsel %vm378_vm0, %v385_v48, %v389_v49  ;;  %v2559_v8 = vor.u32 %v2558_v4, %v2557_v3  ;;  %v2452_v49 = vld [vmem:[#allocation8 + $0x20] sm:$0xff]  ;;  %v2469_v59 = vld [vmem:[#allocation8 + $0xa8] sm:$0xff]  ;;  %vm3123_vm15 = vmand %vm1126_vm13, %vm1127_vm14  ;;  %vm1132_vm3 = vcmask 1043458   ;;  %vm1114_vm6 = vcmask 1043459   ;;  %p2784_p1 = scmp.ne.s32.totalorder %s2782_s27, %s2783_s11  ;;  %p2789_p9 = scmp.lt.s32.totalorder %s2787_s24, %s2783_s11 }
  0x47   : > { %2590 = vmatpush.bf16.msra.mxu3 %v2420_v9  ;;  %625 = vmatpush.bf16.msra.mxu1 %v2420_v9  ;;  %v406_v9 = vsel %vm378_vm0, %v401_v5, %v405_v7  ;;  %v2468_v3 = vld [vmem:[#allocation8 + $0xa0] sm:$0xff]  ;;  %vm1115_vm11 = vsmask.f32 7950  ;;  %vm1945_vm14 = vcmask 1045508  }
  0x48   : > { %v2460_v5 = vld [vmem:[#allocation8 + $0x60] sm:$0xff]  ;;  %vm3162_vm13 = vmand %vm1114_vm6, %vm1115_vm11  ;;  %p2785_p4 = pnand %p2784_p1, %p2949_p3  ;;  %p2790_p2 = por %p2789_p9, %p2788_p11 }
  0x4a   : > { %2583 = vmatpush.bf16.msra.mxu2 %v2427_v11  ;;  %512 = vmatpush.bf16.msra.mxu0 %v2427_v11  ;;  %v697_v11 = vrot.slane %v2559_v8, 1  ;;  %v2467_v8 = vld [vmem:[#allocation8 + $0x98] sm:$0xff]  ;;  %p2786_p8 = pneg %p2785_p4 }
  0x4b   : > { %2591 = vmatpush.bf16.msra.mxu3 %v2419_v12  ;;  %626 = vmatpush.bf16.msra.mxu1 %v2419_v12  ;;  %v698_v12 = vrot.slane %v3023_v40, 1 }
  0x4c   : > { %p2791_p10 = pnand %p2790_p2, %p2786_p8 }
  0x4d   : > { %v699_v14 = vsel %vm696_vm1, %v697_v11, %v698_v12  ;;  %v701_v23 = vsel %vm696_vm1, %v698_v12, %v700_v22 }
  0x4e   : > { %2584 = vmatpush.bf16.msra.mxu2 %v2426_v15  ;;  %513 = vmatpush.bf16.msra.mxu0 %v2426_v15  ;;  %v2413_v15 = vld [vmem:[%s2986_s8 + $0x20] sm:$0xff] }
  0x4f   : > { %2592 = vmatpush.bf16.msra.mxu3 %v2418_v16  ;;  %627 = vmatpush.bf16.msra.mxu1 %v2418_v16  ;;  %v407_v16 = vshrl.u32 %v2412_v1, 16  ;;  %v411_v19 = vshll.u32 %v2413_v15, 16  ;;  %v704_v30 = vrot.slane %v2413_v15, 1 }
  0x51   : > { %v409_v18 = vor.u32 %v407_v16, %v405_v7  ;;  %v707_v33 = vsel %vm696_vm1, %v704_v30, %v706_v32 }
  0x52   : > { %2585 = vmatpush.bf16.msra.mxu2 %v2425_v20  ;;  %514 = vmatpush.bf16.msra.mxu0 %v2425_v20  ;;  %v413_v20 = vrot.slane %v411_v19, 1 }
  0x53   : > { %2593 = vmatpush.bf16.msra.mxu3 %v2417_v21  ;;  %628 = vmatpush.bf16.msra.mxu1 %v2417_v21 }
  0x54   : > { %v414_v21 = vsel %vm378_vm0, %v409_v18, %v413_v20 }
  0x55   : > { %540 = vmatmul.bf16.vlgmr.msra.gmra.mxu2 %v430_v25  ;;  %515 = vmatmul.bf16.vlgmr.msra.gmra.mxu0 %v390_v51  ;;  %v2451_v51 = vld [vmem:[#allocation8 + $0x18] sm:$0xff] }
  0x56   : > { %771 = vmatpush.bf16.msrb.mxu2 %v2440_v24  ;;  %654 = vmatmul.bf16.vlgmr.msra.gmra.mxu3 %v2997_v10  ;;  %v415_v24 = vshrl.u32 %v2413_v15, 16  ;;  %v2471_v10 = vld [vmem:[#allocation8 + $0xb8] sm:$0xff] }
  0x57   : > { %629 = vmatmul.bf16.vlgmr.msra.gmra.mxu1 %v2474_v39  ;;  %v710_v39 = vrot.slane %v3011_v27, 1  ;;  %1492 = vmatpush.bf16.msrb.mxu0 %v2455_v41 }
  0x58   : > { %v417_v25 = vor.u32 %v415_v24, %v413_v20  ;;  %1641 = vmatpush.bf16.msrb.mxu1 %v2471_v10  ;;  %1378 = vmatpush.bf16.msrb.mxu3 %v2463_v34  ;;  %v2466_v20 = vld [vmem:[#allocation8 + $0x90] sm:$0xff]  ;;  %v2464_v10 = vld [vmem:[#allocation8 + $0x80] sm:$0xff] }
  0x59   : > { %v2458_v24 = vld [vmem:[#allocation8 + $0x50] sm:$0xff] }
  0x5a   : > { %772 = vmatpush.bf16.msrb.mxu2 %v2439_v26  ;;  %v422_v26 = vsel %vm378_vm0, %v417_v25, %v3003_v17  ;;  %v1085_v25 = vld [vmem:[#allocation2] sm:$0xf] }
  0x5c   : > { %1642 = vmatpush.bf16.msrb.mxu1 %v2470_v56  ;;  %1379 = vmatpush.bf16.msrb.mxu3 %v2462_v58 }
  0x5e   : > { %773 = vmatpush.bf16.msrb.mxu2 %v2438_v28  ;;  %v702_v28 = vrot.slane %v2412_v1, 1 }
  0x60   : > { %v703_v29 = vsel %vm696_vm1, %v700_v22, %v702_v28  ;;  %1643 = vmatpush.bf16.msrb.mxu1 %v2469_v59 }
  0x62   : > { %774 = vmatpush.bf16.msrb.mxu2 %v2437_v31  ;;  %v705_v31 = vsel %vm696_vm1, %v702_v28, %v704_v30  ;;  %v2465_v30 = vld [vmem:[#allocation8 + $0x88] sm:$0xff] }
  0x64   : > { %1644 = vmatpush.bf16.msrb.mxu1 %v2468_v3 }
  0x65   : > { %545 = vmatmul.bf16.gmra.mxu2 %v438_v37  ;;  %520 = vmatmul.bf16.gmra.mxu0 %v398_v61 }
  0x66   : > { %775 = vmatpush.bf16.msrb.mxu2 %v2436_v36  ;;  %659 = vmatmul.bf16.gmra.mxu3 %v3000_v13  ;;  %v708_v36 = vrot.slane %v3000_v13, 1  ;;  %v2454_v13 = vld [vmem:[#allocation8 + $0x30] sm:$0xff] }
  0x67   : > { %634 = vmatmul.bf16.gmra.mxu1 %v3023_v40  ;;  %1493 = vmatpush.bf16.msrb.mxu0 %v2454_v13 }
  0x68   : > { %v709_v17 = vsel %vm696_vm1, %v706_v32, %v708_v36  ;;  %v711_v42 = vsel %vm696_vm1, %v708_v36, %v710_v39  ;;  %1645 = vmatpush.bf16.msrb.mxu1 %v2467_v8 }
  0x6a   : > { %776 = vmatpush.bf16.msrb.mxu2 %v2435_v38 }
  0x6b   : > { %1494 = vmatpush.bf16.msrb.mxu0 %v2453_v46 }
  0x6c   : > { %1646 = vmatpush.bf16.msrb.mxu1 %v2466_v20 }
  0x6e   : > { %777 = vmatpush.bf16.msrb.mxu2 %v2434_v43 }
  0x6f   : > { %1495 = vmatpush.bf16.msrb.mxu0 %v2452_v49 }
  0x70   : > { %1647 = vmatpush.bf16.msrb.mxu1 %v2465_v30 }
  0x72   : > { %778 = vmatpush.bf16.msrb.mxu2 %v2433_v50 }
  0x73   : > { %1496 = vmatpush.bf16.msrb.mxu0 %v2451_v51 }
  0x74   : > { %1648 = vmatpush.bf16.msrb.mxu1 %v2464_v10 }
  0x75   : > { %550 = vmatmul.bf16.gmra.mxu2 %v446_v54  ;;  %525 = vmatmul.bf16.gmra.mxu0 %v406_v9  ;;  %v2450_v54 = vld [vmem:[#allocation8 + $0x10] sm:$0xff] }
  0x76   : > { %664 = vmatmul.bf16.gmra.mxu3 %v3011_v27  ;;  %v713_v27 = vsel %vm696_vm1, %v710_v39, %v712_v44 }
  0x77   : > { %639 = vmatmul.bf16.gmra.mxu1 %v2411_v55  ;;  %1497 = vmatpush.bf16.msrb.mxu0 %v2450_v54 }
  0x7b   : > { %1498 = vmatpush.bf16.msrb.mxu0 %v2449_v57 }
  0x7f   : > { %1499 = vmatpush.bf16.msrb.mxu0 %v2448_v60 }
  0x85   : > { %555 = vmatmul.bf16.gmra.mxu2 %v449_v63  ;;  %530 = vmatmul.bf16.gmra.mxu0 %v414_v21 }
  0x86   : > { %669 = vmatmul.bf16.gmra.mxu3 %v2672_v0  ;;  %v2461_v0 = vld [vmem:[#allocation8 + $0x68] sm:$0xff] }
  0x87   : > { %644 = vmatmul.bf16.gmra.mxu1 %v2412_v1  ;;  %v3077_v1 = vld [vmem:[%s3367_s3] ss:$0 sm:$0xff]  ;;  %1380 = vmatpush.bf16.msrb.mxu3 %v2461_v0 }
  0x8b   : > { %1381 = vmatpush.bf16.msrb.mxu3 %v2460_v5 }
  0x95   : > { %779 = vmatmul.bf16.vlgmr.msrb.gmra.mxu2 %v699_v14  ;;  %535 = vmatmul.bf16.gmra.mxu0 %v422_v26  ;;  %v2459_v14 = vld [vmem:[#allocation8 + $0x58] sm:$0xff] }
  0x96   : > { %1382 = vmatpush.bf16.msrb.mxu3 %v2459_v14 }
  0x97   : > { %649 = vmatmul.bf16.gmra.mxu1 %v2413_v15 }
  0x9a   : > { %1383 = vmatpush.bf16.msrb.mxu3 %v2458_v24 }
  0xa5   : > { %784 = vmatmul.bf16.gmra.mxu2 %v701_v23 }
  0xb5   : > { %789 = vmatmul.bf16.gmra.mxu2 %v703_v29 }
  0xc5   : > { %794 = vmatmul.bf16.gmra.mxu2 %v705_v31 }
  0xd2   : > { %v516_v47 = vpop.f32.mrf.mxu0 }
  0xd4   : > { %v630_v48 = vpop.f32.mrf.mxu1 }
  0xd5   : > { %799 = vmatmul.bf16.gmra.mxu2 %v707_v33  ;;  %v631_v61 = vadd.f32 %v630_v48, %v516_v47  ;;  %v2457_v33 = vld [vmem:[#allocation8 + $0x48] sm:$0xff]  ;;  %v2456_v47 = vld [vmem:[#allocation8 + $0x40] sm:$0xff] }
  0xd6   : > { %1384 = vmatpush.bf16.msrb.mxu3 %v2457_v33 }
  0xd8   : > { %v3052_v35 = vpop.f32.mrf.mxu2 }
  0xda   : > { %v518_v52 = vpop.f32.mrf.mxu0  ;;  %1385 = vmatpush.bf16.msrb.mxu3 %v2456_v47 }
  0xdc   : > { %v632_v53 = vpop.f32.mrf.mxu1 }
  0xdd   : > { %v633_v11 = vadd.f32 %v632_v53, %v518_v52 }
  0xe0   : > { %v3055_v37 = vpop.f32.mrf.mxu2 }
  0xe2   : > { %v521_v62 = vpop.f32.mrf.mxu0 }
  0xe4   : > { %v635_v63 = vpop.f32.mrf.mxu1 }
  0xe5   : > { %804 = vmatmul.bf16.gmra.mxu2 %v709_v17  ;;  %v636_v29 = vadd.f32 %v635_v63, %v521_v62 }
  0xe8   : > { %v3058_v38 = vpop.f32.mrf.mxu2 }
  0xea   : > { %v523_v12 = vpop.f32.mrf.mxu0 }
  0xec   : > { %v637_v16 = vpop.f32.mrf.mxu1 }
  0xed   : > { %v638_v56 = vadd.f32 %v637_v16, %v523_v12 }
  0xf0   : > { %v3061_v40 = vpop.f32.mrf.mxu2 }
  0xf2   : > { %v526_v41 = vpop.f32.mrf.mxu0 }
  0xf5   : > { %809 = vmatmul.bf16.gmra.mxu2 %v711_v42  ;;  %v640_v42 = vpop.f32.mrf.mxu1 }
  0xf8   : > { %v3064_v43 = vpop.f32.mrf.mxu2 }
  0xfa   : > { %v528_v0 = vpop.f32.mrf.mxu0 }
 0x100   : > { %v3067_v45 = vpop.f32.mrf.mxu2 }
 0x105   : > { %814 = vmatmul.bf16.gmra.mxu2 %v713_v27 }
 0x108   : > { %v3070_v50 = vpop.f32.mrf.mxu2 }
 0x110   : > { %v3072_v55 = vpop.f32.mrf.mxu2 }
 0x115   : > { %819 = vmatmul.bf16.gmra.mxu2 %v712_v44 }
 0x118   : > { %v780_v2 = vpop.f32.mrf.mxu2 }
 0x119   : > { %v825_v4 = vadd.f32 %v780_v2, %v631_v61  ;;  %v642_v2 = vpop.f32.mrf.mxu1 }
 0x11b   : > { %v847_v6 = vadd.f32 %v3077_v1, %v825_v4 }
 0x11d   : > { %v865_v7 = vmax.f32 %v847_v6, 0.0  ;;  %v641_v6 = vadd.f32 %v640_v42, %v526_v41 }
 0x11f   : > { %v883_v9 = vpack.c.bf16 %v865_v7, %v865_v7 }
 0x120   : > { %v782_v15 = vpop.f32.mrf.mxu2 }
 0x121   : > { %v905_v18 = vshrl.u32 %v883_v9, 16  ;;  %v826_v19 = vadd.f32 %v782_v15, %v633_v11  ;;  %v908_v22 = vshll.u32 %v883_v9, 16  ;;  %v645_v24 = vpop.f32.mrf.mxu1 }
 0x123   : > { %v907_v21 = vrot.slane %v905_v18, 7  ;;  %v848_v23 = vadd.f32 %v3077_v1, %v826_v19 }
 0x125   : > { %v910_v26 = vor.u32 %v908_v22, %v907_v21  ;;  %v866_v28 = vmax.f32 %v848_v23, 0.0  ;;  %v911_v48 = vrot.slane %v907_v21, 4  ;;  %v531_v23 = vpop.f32.mrf.mxu0 }
 0x127   : > { %v1086_v31 = vsel %vm1084_vm4, %v910_v26, %v1085_v25  ;;  %v884_v32 = vpack.c.bf16 %v866_v28, %v866_v28  ;;  %vm1133_vm4 = vsmask.f32 3338 }
 0x128   : > { %1087 = vst [vmem:[#allocation2] sm:$0xf] %v1086_v31  ;;  %v785_v36 = vpop.f32.mrf.mxu2  ;;  %vm3139_vm5 = vmand %vm1132_vm3, %vm1133_vm4 }
 0x129   : > { %v913_v17 = vshrl.u32 %v884_v32, 16  ;;  %v827_v39 = vadd.f32 %v785_v36, %v636_v29  ;;  %v916_v44 = vshll.u32 %v884_v32, 16  ;;  %v643_v29 = vadd.f32 %v642_v2, %v528_v0 }
 0x12b   : > { %v915_v13 = vrot.slane %v913_v17, 7  ;;  %v849_v46 = vadd.f32 %v3077_v1, %v827_v39 }
 0x12d   : > { %v918_v51 = vor.u32 %v916_v44, %v915_v13  ;;  %v867_v52 = vmax.f32 %v849_v46, 0.0  ;;  %v920_v3 = vrot.slane %v915_v13, 4  ;;  %v646_v46 = vadd.f32 %v645_v24, %v531_v23 }
 0x12f   : > { %v1111_v53 = vld [vmem:[#allocation2] sm:$0x1]  ;;  %v919_v54 = vsel %vm3084_vm8, %v911_v48, %v918_v51  ;;  %v885_v34 = vpack.c.bf16 %v867_v52, %v867_v52  ;;  %v2561_v47 = vld [vmem:[#allocation2] sm:$0xe] }
 0x130   : > { %v1112_v57 = vsel %vm3090_vm9, 0, %v1111_v53  ;;  %1088 = vst [vmem:[#allocation2 + $0x4] sm:$0xf] %v919_v54  ;;  %v787_v58 = vpop.f32.mrf.mxu2  ;;  %v533_v53 = vpop.f32.mrf.mxu0 }
 0x131   : > { %1113 = vst [vmem:[#allocation2] sm:$0x1] %v1112_v57  ;;  %v922_v59 = vshrl.u32 %v885_v34, 16  ;;  %v828_v60 = vadd.f32 %v787_v58, %v638_v56  ;;  %v925_v62 = vshll.u32 %v885_v34, 16  ;;  %v647_v56 = vpop.f32.mrf.mxu1 }
 0x133   : > { %v924_v61 = vrot.slane %v922_v59, 7  ;;  %v850_v63 = vadd.f32 %v3077_v1, %v828_v60 }
 0x135   : > { %v927_v4 = vor.u32 %v925_v62, %v924_v61  ;;  %v868_v5 = vmax.f32 %v850_v63, 0.0  ;;  %v929_v19 = vrot.slane %v924_v61, 4 }
 0x137   : > { %v928_v7 = vsel %vm3084_vm8, %v920_v3, %v927_v4  ;;  %v886_v8 = vpack.c.bf16 %v868_v5, %v868_v5  ;;  %v2560_v41 = vld [vmem:[#allocation2] sm:$0xf0] }
 0x138   : > { %1089 = vst [vmem:[#allocation2 + $0x8] sm:$0xf] %v928_v7  ;;  %v790_v9 = vpop.f32.mrf.mxu2  ;;  %v2478_v11 = vld [vmem:[#allocation2] sm:$0xff]   ;;  %v2562_v48 = vor.u32 %v2561_v47, %v2560_v41  ;;  %v536_v24 = vpop.f32.mrf.mxu0 }
 0x139   : > { %v931_v12 = vshrl.u32 %v886_v8, 16  ;;  %v829_v14 = vadd.f32 %v790_v9, %v641_v6  ;;  %1500 = vmatmul.bf16.vlgmr.msrb.gmra.mxu0 %v2478_v11  ;;  %v934_v16 = vshll.u32 %v886_v8, 16  ;;  %v1253_v10 = vshll.u32 %v2478_v11, 16 }
 0x13a   : > { %v1251_v60 = vshrl.u32 %v2478_v11, 16  ;;  %v1567_v61 = vrot.slane %v2562_v48, 1 }
 0x13b   : > { %v933_v15 = vrot.slane %v931_v12, 7  ;;  %v851_v18 = vadd.f32 %v3077_v1, %v829_v14  ;;  %v1255_v54 = vrot.slane %v1253_v10, 1 }
 0x13d   : > { %v936_v21 = vor.u32 %v934_v16, %v933_v15  ;;  %v869_v22 = vmax.f32 %v851_v18, 0.0  ;;  %v938_v42 = vrot.slane %v933_v15, 4  ;;  %v1256_v5 = vor.u32 %v1255_v54, %v1251_v60 }
 0x13e   : > { %v648_v18 = vadd.f32 %v647_v56, %v533_v53 }
 0x13f   : > { %v1123_v25 = vld [vmem:[#allocation2 + $0x8] sm:$0x3]  ;;  %v937_v26 = vsel %vm3084_vm8, %v929_v19, %v936_v21  ;;  %v887_v28 = vpack.c.bf16 %v869_v22, %v869_v22 }
 0x140   : > { %v1124_v30 = vsel %vm3103_vm12, 0, %v1123_v25  ;;  %1090 = vst [vmem:[#allocation2 + $0xc] sm:$0xf] %v937_v26  ;;  %v792_v31 = vpop.f32.mrf.mxu2  ;;  %v650_v25 = vpop.f32.mrf.mxu1 }
 0x141   : > { %1125 = vst [vmem:[#allocation2 + $0x8] sm:$0x3] %v1124_v30  ;;  %v940_v32 = vshrl.u32 %v887_v28, 16  ;;  %v830_v33 = vadd.f32 %v792_v31, %v643_v29  ;;  %v943_v17 = vshll.u32 %v887_v28, 16  ;;  %v538_v53 = vpop.f32.mrf.mxu0 }
 0x143   : > { %v942_v36 = vrot.slane %v940_v32, 7  ;;  %v852_v39 = vadd.f32 %v3077_v1, %v830_v33  ;;  %v651_v33 = vadd.f32 %v650_v25, %v536_v24 }
 0x145   : > { %v945_v13 = vor.u32 %v943_v17, %v942_v36  ;;  %v870_v44 = vmax.f32 %v852_v39, 0.0  ;;  %v947_v7 = vrot.slane %v942_v36, 4  ;;  %v655_v36 = vpop.f32.mrf.mxu3 }
 0x147   : > { %v946_v51 = vsel %vm3084_vm8, %v938_v42, %v945_v13  ;;  %v888_v52 = vpack.c.bf16 %v870_v44, %v870_v44 }
 0x148   : > { %1091 = vst [vmem:[#allocation2 + $0x10] sm:$0xf] %v946_v51  ;;  %v795_v34 = vpop.f32.mrf.mxu2  ;;  %v3114_v57 = vld [vmem:[#allocation2 + $0x8] sm:$0xff]  ;;  %v652_v54 = vpop.f32.mrf.mxu1 }
 0x149   : > { %v949_v58 = vshrl.u32 %v888_v52, 16  ;;  %v831_v59 = vadd.f32 %v795_v34, %v646_v46  ;;  %1505 = vmatmul.bf16.gmra.mxu0 %v3114_v57  ;;  %v1568_v62 = vrot.slane %v3114_v57, 1  ;;  %v1258_v63 = vshll.u32 %v3114_v57, 16 }
 0x14a   : > { %v952_v2 = vshll.u32 %v888_v52, 16  ;;  %v1262_v46 = vshrl.u32 %v3114_v57, 16 }
 0x14b   : > { %v951_v0 = vrot.slane %v949_v58, 7  ;;  %v853_v3 = vadd.f32 %v3077_v1, %v831_v59  ;;  %v1569_v4 = vsel %vm696_vm1, %v1567_v61, %v1568_v62  ;;  %v1260_v6 = vrot.slane %v1258_v63, 1 }
 0x14c   : > { %1649 = vmatmul.bf16.vlgmr.msrb.gmra.mxu1 %v1569_v4  ;;  %v653_v4 = vadd.f32 %v652_v54, %v538_v53 }
 0x14d   : > { %v954_v9 = vor.u32 %v952_v2, %v951_v0  ;;  %v871_v11 = vmax.f32 %v853_v3, 0.0  ;;  %v1261_v12 = vsel %vm378_vm0, %v1256_v5, %v1260_v6  ;;  %v956_v30 = vrot.slane %v951_v0, 4 }
 0x14e   : > { %1386 = vmatmul.bf16.vlgmr.msrb.gmra.mxu3 %v1261_v12  ;;  %v1264_v56 = vor.u32 %v1262_v46, %v1260_v6 }
 0x14f   : > { %v1129_v14 = vld [vmem:[#allocation2 + $0x10] sm:$0x6]  ;;  %v955_v15 = vsel %vm3084_vm8, %v947_v7, %v954_v9  ;;  %v889_v16 = vpack.c.bf16 %v871_v11, %v871_v11 }
 0x150   : > { %v1130_v19 = vsel %vm3123_vm15, 0, %v1129_v14  ;;  %1092 = vst [vmem:[#allocation2 + $0x14] sm:$0xf] %v955_v15  ;;  %v797_v21 = vpop.f32.mrf.mxu2 }
 0x151   : > { %1131 = vst [vmem:[#allocation2 + $0x10] sm:$0x6] %v1130_v19  ;;  %v958_v22 = vshrl.u32 %v889_v16, 16  ;;  %v832_v23 = vadd.f32 %v797_v21, %v648_v18  ;;  %v961_v28 = vshll.u32 %v889_v16, 16  ;;  %v656_v19 = vadd.f32 %v655_v36, %v3052_v35 }
 0x153   : > { %v960_v26 = vrot.slane %v958_v22, 7  ;;  %v854_v29 = vadd.f32 %v3077_v1, %v832_v23 }
 0x155   : > { %v963_v31 = vor.u32 %v961_v28, %v960_v26  ;;  %v872_v32 = vmax.f32 %v854_v29, 0.0  ;;  %v965_v59 = vrot.slane %v960_v26, 4 }
 0x157   : > { %v964_v17 = vsel %vm3084_vm8, %v956_v30, %v963_v31  ;;  %v890_v39 = vpack.c.bf16 %v872_v32, %v872_v32 }
 0x158   : > { %1093 = vst [vmem:[#allocation2 + $0x18] sm:$0xf] %v964_v17  ;;  %v800_v41 = vpop.f32.mrf.mxu2  ;;  %v2442_v10 = vld [vmem:[#allocation2 + $0x10] sm:$0xff] }
 0x159   : > { %v967_v42 = vshrl.u32 %v890_v39, 16  ;;  %v833_v13 = vadd.f32 %v800_v41, %v651_v33  ;;  %1510 = vmatmul.bf16.gmra.mxu0 %v2442_v10  ;;  %v1570_v44 = vrot.slane %v2442_v10, 1  ;;  %v1266_v47 = vshll.u32 %v2442_v10, 16 }
 0x15a   : > { %v970_v51 = vshll.u32 %v890_v39, 16  ;;  %v1270_v30 = vshrl.u32 %v2442_v10, 16 }
 0x15b   : > { %v969_v48 = vrot.slane %v967_v42, 7  ;;  %v855_v52 = vadd.f32 %v3077_v1, %v833_v13  ;;  %v1571_v34 = vsel %vm696_vm1, %v1568_v62, %v1570_v44  ;;  %v1268_v58 = vrot.slane %v1266_v47, 1  ;;  %v657_v62 = vpop.f32.mrf.mxu3 }
 0x15c   : > { %1654 = vmatmul.bf16.gmra.mxu1 %v1571_v34  ;;  %v658_v47 = vadd.f32 %v657_v62, %v3055_v37 }
 0x15d   : > { %v972_v61 = vor.u32 %v970_v51, %v969_v48  ;;  %v873_v63 = vmax.f32 %v855_v52, 0.0  ;;  %v1269_v57 = vsel %vm378_vm0, %v1264_v56, %v1268_v58  ;;  %v974_v15 = vrot.slane %v969_v48, 4 }
 0x15e   : > { %1391 = vmatmul.bf16.gmra.mxu3 %v1269_v57  ;;  %v1272_v17 = vor.u32 %v1270_v30, %v1268_v58 }
 0x15f   : > { %v1135_v0 = vld [vmem:[#allocation2 + $0x18] sm:$0xc]  ;;  %v973_v2 = vsel %vm3084_vm8, %v965_v59, %v972_v61  ;;  %v891_v3 = vpack.c.bf16 %v873_v63, %v873_v63 }
 0x160   : > { %v1136_v5 = vsel %vm3139_vm5, 0, %v1135_v0  ;;  %1094 = vst [vmem:[#allocation2 + $0x1c] sm:$0xf] %v973_v2  ;;  %v802_v6 = vpop.f32.mrf.mxu2 }
 0x161   : > { %1137 = vst [vmem:[#allocation2 + $0x18] sm:$0xc] %v1136_v5  ;;  %v976_v7 = vshrl.u32 %v891_v3, 16  ;;  %v834_v9 = vadd.f32 %v802_v6, %v653_v4  ;;  %v979_v12 = vshll.u32 %v891_v3, 16 }
 0x163   : > { %v978_v11 = vrot.slane %v976_v7, 7  ;;  %v856_v14 = vadd.f32 %v3077_v1, %v834_v9  ;;  %v660_v28 = vpop.f32.mrf.mxu3 }
 0x164   : > { %v661_v0 = vadd.f32 %v660_v28, %v3058_v38 }
 0x165   : > { %v981_v16 = vor.u32 %v979_v12, %v978_v11  ;;  %v874_v18 = vmax.f32 %v856_v14, 0.0  ;;  %v983_v41 = vrot.slane %v978_v11, 4 }
 0x167   : > { %v982_v21 = vsel %vm3084_vm8, %v974_v15, %v981_v16  ;;  %v892_v22 = vpack.c.bf16 %v874_v18, %v874_v18 }
 0x168   : > { %1095 = vst [vmem:[#allocation2 + $0x20] sm:$0xf] %v982_v21  ;;  %v805_v23 = vpop.f32.mrf.mxu2  ;;  %v3152_v24 = vld [vmem:[#allocation2 + $0x18] sm:$0xff] }
 0x169   : > { %v985_v25 = vshrl.u32 %v892_v22, 16  ;;  %v835_v26 = vadd.f32 %v805_v23, %v656_v19  ;;  %1515 = vmatmul.bf16.gmra.mxu0 %v3152_v24  ;;  %v1572_v29 = vrot.slane %v3152_v24, 1  ;;  %v1274_v35 = vshll.u32 %v3152_v24, 16 }
 0x16a   : > { %v988_v32 = vshll.u32 %v892_v22, 16  ;;  %v1278_v28 = vshrl.u32 %v3152_v24, 16 }
 0x16b   : > { %v987_v31 = vrot.slane %v985_v25, 7  ;;  %v857_v33 = vadd.f32 %v3077_v1, %v835_v26  ;;  %v1573_v36 = vsel %vm696_vm1, %v1570_v44, %v1572_v29  ;;  %v1276_v39 = vrot.slane %v1274_v35, 1  ;;  %v662_v61 = vpop.f32.mrf.mxu3 }
 0x16c   : > { %1659 = vmatmul.bf16.gmra.mxu1 %v1573_v36  ;;  %v663_v18 = vadd.f32 %v662_v61, %v3061_v40 }
 0x16d   : > { %v990_v13 = vor.u32 %v988_v32, %v987_v31  ;;  %v875_v10 = vmax.f32 %v857_v33, 0.0  ;;  %v1277_v46 = vsel %vm378_vm0, %v1272_v17, %v1276_v39  ;;  %v992_v37 = vrot.slane %v987_v31, 4 }
 0x16e   : > { %1396 = vmatmul.bf16.gmra.mxu3 %v1277_v46  ;;  %v1280_v33 = vor.u32 %v1278_v28, %v1276_v39 }
 0x16f   : > { %v1138_v48 = vld [vmem:[#allocation2 + $0x20] sm:$0x8]  ;;  %v991_v51 = vsel %vm3084_vm8, %v983_v41, %v990_v13  ;;  %v893_v44 = vpack.c.bf16 %v875_v10, %v875_v10 }
 0x170   : > { %v1139_v52 = vsel %vm3162_vm13, 0, %v1138_v48  ;;  %1096 = vst [vmem:[#allocation2 + $0x24] sm:$0xf] %v991_v51  ;;  %v807_v53 = vpop.f32.mrf.mxu2 }
 0x171   : > { %1140 = vst [vmem:[#allocation2 + $0x20] sm:$0x8] %v1139_v52  ;;  %v994_v54 = vshrl.u32 %v893_v44, 16  ;;  %v836_v34 = vadd.f32 %v807_v53, %v658_v47  ;;  %v997_v58 = vshll.u32 %v893_v44, 16 }
 0x173   : > { %v996_v56 = vrot.slane %v994_v54, 7  ;;  %v858_v59 = vadd.f32 %v3077_v1, %v836_v34  ;;  %v665_v16 = vpop.f32.mrf.mxu3 }
 0x174   : > { %v666_v46 = vadd.f32 %v665_v16, %v3064_v43 }
 0x175   : > { %v999_v63 = vor.u32 %v997_v58, %v996_v56  ;;  %v876_v57 = vmax.f32 %v858_v59, 0.0  ;;  %v1001_v14 = vrot.slane %v996_v56, 4 }
 0x177   : > { %v1141_v2 = vld [vmem:[#allocation2 + $0x24] sm:$0x1]  ;;  %v1000_v3 = vsel %vm3084_vm8, %v992_v37, %v999_v63  ;;  %v894_v4 = vpack.c.bf16 %v876_v57, %v876_v57 }
 0x178   : > { %v1142_v62 = vsel %vm3090_vm9, 0, %v1141_v2  ;;  %1097 = vst [vmem:[#allocation2 + $0x28] sm:$0xf] %v1000_v3  ;;  %v810_v5 = vpop.f32.mrf.mxu2  ;;  %vm1104_vm9 = vsmask.f32 3328 }
 0x179   : > { %1143 = vst [vmem:[#allocation2 + $0x24] sm:$0x1] %v1142_v62  ;;  %v1003_v6 = vshrl.u32 %v894_v4, 16  ;;  %v837_v7 = vadd.f32 %v810_v5, %v661_v0  ;;  %v1006_v11 = vshll.u32 %v894_v4, 16 }
 0x17b   : > { %v1005_v9 = vrot.slane %v1003_v6, 7  ;;  %v859_v12 = vadd.f32 %v3077_v1, %v837_v7  ;;  %v667_v44 = vpop.f32.mrf.mxu3 }
 0x17c   : > { %v668_v59 = vadd.f32 %v667_v44, %v3067_v45 }
 0x17d   : > { %v1008_v15 = vor.u32 %v1006_v11, %v1005_v9  ;;  %v877_v38 = vmax.f32 %v859_v12, 0.0  ;;  %v1010_v17 = vrot.slane %v1005_v9, 4 }
 0x17f   : > { %v1009_v19 = vsel %vm3084_vm8, %v1001_v14, %v1008_v15  ;;  %v895_v49 = vpack.c.bf16 %v877_v38, %v877_v38 }
 0x180   : > { %1098 = vst [vmem:[#allocation2 + $0x2c] sm:$0xf] %v1009_v19  ;;  %v812_v21 = vpop.f32.mrf.mxu2  ;;  %v2444_v22 = vld [vmem:[#allocation2 + $0x20] sm:$0xff] }
 0x181   : > { %v1012_v23 = vshrl.u32 %v895_v49, 16  ;;  %v838_v25 = vadd.f32 %v812_v21, %v663_v18  ;;  %1520 = vmatmul.bf16.gmra.mxu0 %v2444_v22  ;;  %v1574_v26 = vrot.slane %v2444_v22, 1  ;;  %v1282_v30 = vshll.u32 %v2444_v22, 16 }
 0x182   : > { %v1015_v31 = vshll.u32 %v895_v49, 16  ;;  %v1286_v4 = vshrl.u32 %v2444_v22, 16 }
 0x183   : > { %v1014_v35 = vrot.slane %v1012_v23, 7  ;;  %v860_v32 = vadd.f32 %v3077_v1, %v838_v25  ;;  %v1575_v40 = vsel %vm696_vm1, %v1572_v29, %v1574_v26  ;;  %v1284_v36 = vrot.slane %v1282_v30, 1  ;;  %v670_v2 = vpop.f32.mrf.mxu3 }
 0x184   : > { %1664 = vmatmul.bf16.gmra.mxu1 %v1575_v40  ;;  %v671_v16 = vadd.f32 %v670_v2, %v3070_v50 }
 0x185   : > { %v1017_v41 = vor.u32 %v1015_v31, %v1014_v35  ;;  %v878_v13 = vmax.f32 %v860_v32, 0.0  ;;  %v1285_v10 = vsel %vm378_vm0, %v1280_v33, %v1284_v36  ;;  %v1019_v43 = vrot.slane %v1014_v35, 4 }
 0x186   : > { %1401 = vmatmul.bf16.gmra.mxu3 %v1285_v10  ;;  %v1288_v9 = vor.u32 %v1286_v4, %v1284_v36 }
 0x187   : > { %v1144_v47 = vld [vmem:[#allocation2 + $0x2c] sm:$0x3]  ;;  %v1018_v48 = vsel %vm3084_vm8, %v1010_v17, %v1017_v41  ;;  %v896_v51 = vpack.c.bf16 %v878_v13, %v878_v13 }
 0x188   : > { %v1145_v24 = vsel %vm3103_vm12, 0, %v1144_v47  ;;  %1099 = vst [vmem:[#allocation2 + $0x30] sm:$0xf] %v1018_v48  ;;  %v815_v29 = vpop.f32.mrf.mxu2  ;;  %vm1105_vm12 = vmand %vm1082_vm2, %vm1104_vm9  ;;  %vm1926_vm2 = vcmask 1046532  }
 0x189   : > { %1146 = vst [vmem:[#allocation2 + $0x2c] sm:$0x3] %v1145_v24  ;;  %v1021_v39 = vshrl.u32 %v896_v51, 16  ;;  %v839_v52 = vadd.f32 %v815_v29, %v666_v46  ;;  %v1024_v54 = vshll.u32 %v896_v51, 16 }
 0x18b   : > { %v1023_v53 = vrot.slane %v1021_v39, 7  ;;  %v861_v34 = vadd.f32 %v3077_v1, %v839_v52  ;;  %v672_v35 = vpop.f32.mrf.mxu3 }
 0x18c   : > { %v673_v40 = vadd.f32 %v672_v35, %v3072_v55  ;;  %v2563_v35 = vld [vmem:[%s2986_s8 + $0x8] sm:$0xff]  }
 0x18d   : > { %v1026_v56 = vor.u32 %v1024_v54, %v1023_v53  ;;  %v879_v58 = vmax.f32 %v861_v34, 0.0  ;;  %v1028_v12 = vrot.slane %v1023_v53, 4 }
 0x18f   : > { %v1027_v61 = vsel %vm3084_vm8, %v1019_v43, %v1026_v56  ;;  %v897_v37 = vpack.c.bf16 %v879_v58, %v879_v58 }
 0x190   : > { %1100 = vst [vmem:[#allocation2 + $0x34] sm:$0xf] %v1027_v61  ;;  %v817_v20 = vpop.f32.mrf.mxu2  ;;  %v2445_v63 = vld [vmem:[#allocation2 + $0x28] sm:$0xff] }
 0x191   : > { %v1030_v57 = vshrl.u32 %v897_v37, 16  ;;  %v840_v0 = vadd.f32 %v817_v20, %v668_v59  ;;  %1525 = vmatmul.bf16.gmra.mxu0 %v2445_v63  ;;  %v1576_v3 = vrot.slane %v2445_v63, 1  ;;  %v1290_v62 = vshll.u32 %v2445_v63, 16 }
 0x192   : > { %v1033_v6 = vshll.u32 %v897_v37, 16  ;;  %v1294_v46 = vshrl.u32 %v2445_v63, 16  ;;  %v1106_v63 = vld [vmem:[#allocation2 + $0x44] sm:$0xf] }
 0x193   : > { %v1032_v5 = vrot.slane %v1030_v57, 7  ;;  %v862_v7 = vadd.f32 %v3077_v1, %v840_v0  ;;  %v1577_v45 = vsel %vm696_vm1, %v1574_v26, %v1576_v3  ;;  %v1292_v11 = vrot.slane %v1290_v62, 1 }
 0x194   : > { %1669 = vmatmul.bf16.gmra.mxu1 %v1577_v45 }
 0x195   : > { %v1035_v14 = vor.u32 %v1033_v6, %v1032_v5  ;;  %v880_v15 = vmax.f32 %v862_v7, 0.0  ;;  %v1293_v38 = vsel %vm378_vm0, %v1288_v9, %v1292_v11  ;;  %v1037_v50 = vrot.slane %v1032_v5, 4 }
 0x196   : > { %1406 = vmatmul.bf16.gmra.mxu3 %v1293_v38  ;;  %v1296_v55 = vor.u32 %v1294_v46, %v1292_v11 }
 0x197   : > { %v1147_v18 = vld [vmem:[#allocation2 + $0x34] sm:$0x6]  ;;  %v1036_v19 = vsel %vm3084_vm8, %v1028_v12, %v1035_v14  ;;  %v898_v49 = vpack.c.bf16 %v880_v15, %v880_v15 }
 0x198   : > { %v1148_v21 = vsel %vm3123_vm15, 0, %v1147_v18  ;;  %1101 = vst [vmem:[#allocation2 + $0x38] sm:$0xf] %v1036_v19  ;;  %v820_v22 = vpop.f32.mrf.mxu2  ;;  %vm3259_vm15 = vmor %vm1120_vm10, %vm1945_vm14  ;;  %vm1964_vm10 = vcmask 1044484  }
 0x199   : > { %1149 = vst [vmem:[#allocation2 + $0x34] sm:$0x6] %v1148_v21  ;;  %v1039_v23 = vshrl.u32 %v898_v49, 16  ;;  %v841_v25 = vadd.f32 %v820_v22, %v671_v16  ;;  %v1042_v28 = vshll.u32 %v898_v49, 16  ;;  %vm3277_vm3 = vmor %vm1109_vm7, %vm1964_vm10 }
 0x19b   : > { %v1041_v26 = vrot.slane %v1039_v23, 7  ;;  %v863_v30 = vadd.f32 %v3077_v1, %v841_v25  ;;  %v2482_v25 = vld [vmem:[%s2986_s8] sm:$0xff]  }
 0x19d   : > { %v1044_v31 = vor.u32 %v1042_v28, %v1041_v26  ;;  %v881_v32 = vmax.f32 %v863_v30, 0.0  ;;  %v1046_v39 = vrot.slane %v1041_v26, 4 }
 0x19f   : > { %v1045_v33 = vsel %vm3084_vm8, %v1037_v50, %v1044_v31  ;;  %v899_v8 = vpack.c.bf16 %v881_v32, %v881_v32  ;;  %v2483_v31 = vunpack.c.l.bf16 %v2482_v25  ;;  %v2484_v32 = vunpack.c.h.bf16 %v2482_v25 }
 0x1a0   : > { %1102 = vst [vmem:[#allocation2 + $0x3c] sm:$0xf] %v1045_v33  ;;  %v822_v36 = vpop.f32.mrf.mxu2  ;;  %v2446_v17 = vld [vmem:[#allocation2 + $0x30] sm:$0xff] }
 0x1a1   : > { %v1048_v41 = vshrl.u32 %v899_v8, 16  ;;  %v842_v13 = vadd.f32 %v822_v36, %v673_v40  ;;  %1530 = vmatmul.bf16.gmra.mxu0 %v2446_v17  ;;  %v1578_v10 = vrot.slane %v2446_v17, 1  ;;  %v1298_v47 = vshll.u32 %v2446_v17, 16 }
 0x1a2   : > { %v1051_v51 = vshll.u32 %v899_v8, 16  ;;  %v2487_v40 = vunpack.c.l.bf16 %v2563_v35  ;;  %v3230_v8 = vld [vmem:[%s3368_s4] ss:$0 sm:$0xff] }
 0x1a3   : > { %v1050_v48 = vrot.slane %v1048_v41, 7  ;;  %v864_v44 = vadd.f32 %v3077_v1, %v842_v13  ;;  %v1579_v24 = vsel %vm696_vm1, %v1576_v3, %v1578_v10  ;;  %v1300_v29 = vrot.slane %v1298_v47, 1 }
 0x1a4   : > { %1674 = vmatmul.bf16.gmra.mxu1 %v1579_v24  ;;  %v1302_v3 = vshrl.u32 %v2446_v17, 16  ;;  %v1790_v17 = vrot.slane %v2483_v31, 1  ;;  %v1791_v41 = vrot.slane %v2484_v32, 1  ;;  %v1793_v46 = vrot.slane %v2487_v40, 1 }
 0x1a5   : > { %v1053_v52 = vor.u32 %v1051_v51, %v1050_v48  ;;  %v882_v53 = vmax.f32 %v864_v44, 0.0  ;;  %v1301_v54 = vsel %vm378_vm0, %v1296_v55, %v1300_v29  ;;  %v1055_v37 = vrot.slane %v1050_v48, 4 }
 0x1a6   : > { %1411 = vmatmul.bf16.gmra.mxu3 %v1301_v54  ;;  %v1304_v5 = vor.u32 %v1302_v3, %v1300_v29  ;;  %v1792_v51 = vsel %vm696_vm1, %v1790_v17, %v1791_v41  ;;  %v1794_v29 = vsel %vm696_vm1, %v1791_v41, %v1793_v46 }
 0x1a7   : > { %v1150_v34 = vld [vmem:[#allocation2 + $0x3c] sm:$0xc]  ;;  %v1054_v43 = vsel %vm3084_vm8, %v1046_v39, %v1053_v52  ;;  %v900_v56 = vpack.c.bf16 %v882_v53, %v882_v53 }
 0x1a8   : > { %v1151_v58 = vsel %vm3139_vm5, 0, %v1150_v34  ;;  %1103 = vst [vmem:[#allocation2 + $0x40] sm:$0xf] %v1054_v43 }
 0x1a9   : > { %1152 = vst [vmem:[#allocation2 + $0x3c] sm:$0xc] %v1151_v58  ;;  %v1057_v1 = vshrl.u32 %v900_v56, 16  ;;  %v1060_v61 = vshll.u32 %v900_v56, 16  ;;  %v2564_v58 = vld [vmem:[%s2986_s8 + $0x10] sm:$0xff]  }
 0x1ab   : > { %v1059_v59 = vrot.slane %v1057_v1, 7  ;;  %v2488_v1 = vunpack.c.h.bf16 %v2563_v35 }
 0x1ad   : > { %v1062_v20 = vor.u32 %v1060_v61, %v1059_v59 }
 0x1af   : > { %v1063_v57 = vsel %vm3084_vm8, %v1055_v37, %v1062_v20  ;;  %v2675_v14 = vld [vmem:[#allocation2 + $0x40] sm:$0xf]   ;;  %v2491_v37 = vunpack.c.l.bf16 %v2564_v58 }
 0x1b0   : > { %v1107_v0 = vsel %vm1105_vm12, %v1063_v57, %v1106_v63  ;;  %v2447_v2 = vld [vmem:[#allocation2 + $0x38] sm:$0xff]  ;;  %v1795_v57 = vrot.slane %v2488_v1, 1 }
 0x1b1   : > { %1108 = vst [vmem:[#allocation2 + $0x44] sm:$0xf] %v1107_v0  ;;  %1535 = vmatmul.bf16.gmra.mxu0 %v2447_v2  ;;  %v1580_v60 = vrot.slane %v2447_v2, 1  ;;  %v1306_v4 = vshll.u32 %v2447_v2, 16  ;;  %v1310_v16 = vshrl.u32 %v2447_v2, 16  ;;  %v1797_v2 = vrot.slane %v2491_v37, 1 }
 0x1b3   : > { %v1581_v62 = vsel %vm696_vm1, %v1578_v10, %v1580_v60  ;;  %v1308_v6 = vrot.slane %v1306_v4, 1  ;;  %v1796_v4 = vsel %vm696_vm1, %v1793_v46, %v1795_v57 }
 0x1b4   : > { %1679 = vmatmul.bf16.gmra.mxu1 %v1581_v62 }
 0x1b5   : > { %v1309_v7 = vsel %vm378_vm0, %v1304_v5, %v1308_v6  ;;  %v1312_v49 = vor.u32 %v1310_v16, %v1308_v6  ;;  %v1798_v6 = vsel %vm696_vm1, %v1795_v57, %v1797_v2  ;;  %v2565_v16 = vld [vmem:[%s2986_s8 + $0x18] sm:$0xff]  }
 0x1b6   : > { %1416 = vmatmul.bf16.gmra.mxu3 %v1309_v7  ;;  %v1501_v11 = vpop.f32.mrf.mxu0 }
 0x1b8   : > { %v1117_v45 = vld [vmem:[#allocation2 + $0x44] sm:$0x8]  ;;  %v2824_v9 = vld [vmem:[#allocation2 + $0x40] sm:$0x70] }
 0x1b9   : > { %v1118_v27 = vsel %vm3162_vm13, 0, %v1117_v45  ;;  %v2676_v15 = vor.u32 %v2824_v9, %v2675_v14 }
 0x1ba   : > { %1119 = vst [vmem:[#allocation2 + $0x44] sm:$0x8] %v1118_v27 }
 0x1be   : > { %v1503_v22 = vpop.f32.mrf.mxu0 }
 0x1c1   : > { %v1169_v12 = vld [vmem:[#allocation2 + $0x40] sm:$0xff]   ;;  %1540 = vmatmul.bf16.gmra.mxu0 %v2676_v15 }
 0x1c2   : > { %v1582_v38 = vrot.slane %v1169_v12, 1  ;;  %v1314_v18 = vshll.u32 %v1169_v12, 16  ;;  %v1318_v36 = vshrl.u32 %v1169_v12, 16 }
 0x1c4   : > { %v1583_v19 = vsel %vm696_vm1, %v1580_v60, %v1582_v38  ;;  %v1316_v21 = vrot.slane %v1314_v18, 1  ;;  %v2492_v18 = vunpack.c.h.bf16 %v2564_v58 }
 0x1c5   : > { %1684 = vmatmul.bf16.gmra.mxu1 %v1583_v19 }
 0x1c6   : > { %v1317_v42 = vsel %vm378_vm0, %v1312_v49, %v1316_v21  ;;  %v1506_v50 = vpop.f32.mrf.mxu0  ;;  %v1320_v13 = vor.u32 %v1318_v36, %v1316_v21  ;;  %v2495_v49 = vunpack.c.l.bf16 %v2565_v16  ;;  %vm1925_vm0 = vcmask 1042432  }
 0x1c7   : > { %1421 = vmatmul.bf16.gmra.mxu3 %v1317_v42  ;;  %vm3248_vm8 = vmor %vm1925_vm0, %vm1926_vm2 }
 0x1c8   : > { %v1801_v25 = vrot.slane %v2495_v49, 1  ;;  %v2567_v49 = vld [vmem:[%s2986_s8 + $0x28] sm:$0xff]  }
 0x1c9   : > { %v1650_v23 = vpop.f32.mrf.mxu1 }
 0x1ce   : > { %v1508_v55 = vpop.f32.mrf.mxu0 }
 0x1d1   : > { %v1387_v26 = vpop.f32.mrf.mxu3  ;;  %v1652_v28 = vpop.f32.mrf.mxu1 }
 0x1d2   : > { %v1502_v30 = vadd.f32 %v1501_v11, %v1387_v26 }
 0x1d4   : > { %v1695_v33 = vadd.f32 %v1650_v23, %v1502_v30 }
 0x1d5   : > { %1689 = vmatmul.bf16.gmra.mxu1 %v1582_v38 }
 0x1d6   : > { %v1717_v47 = vadd.f32 %v3230_v8, %v1695_v33  ;;  %v1511_v63 = vpop.f32.mrf.mxu0 }
 0x1d7   : > { %1426 = vmatmul.bf16.gmra.mxu3 %v1320_v13 }
 0x1d8   : > { %v1843_v39 = vadd.f32 %v1792_v51, %v1717_v47 }
 0x1d9   : > { %v1389_v10 = vpop.f32.mrf.mxu3  ;;  %v1655_v44 = vpop.f32.mrf.mxu1 }
 0x1da   : > { %v1504_v48 = vadd.f32 %v1503_v22, %v1389_v10  ;;  %v1861_v34 = vmax.f32 %v1843_v39, 0.0  ;;  %v1799_v22 = vrot.slane %v2492_v18, 1 }
 0x1dc   : > { %v1696_v24 = vadd.f32 %v1652_v28, %v1504_v48  ;;  %v1800_v35 = vsel %vm696_vm1, %v1797_v2, %v1799_v22  ;;  %v1802_v33 = vsel %vm696_vm1, %v1799_v22, %v1801_v25 }
 0x1de   : > { %v1718_v52 = vadd.f32 %v3230_v8, %v1696_v24  ;;  %v1513_v11 = vpop.f32.mrf.mxu0 }
 0x1e0   : > { %v1844_v53 = vadd.f32 %v1794_v29, %v1718_v52  ;;  %v2566_v52 = vld [vmem:[%s2986_s8 + $0x20] sm:$0xff]  }
 0x1e1   : > { %v1392_v54 = vpop.f32.mrf.mxu3  ;;  %v1657_v61 = vpop.f32.mrf.mxu1 }
 0x1e2   : > { %v1862_v43 = vmax.f32 %v1844_v53, 0.0  ;;  %v1507_v56 = vadd.f32 %v1506_v50, %v1392_v54  ;;  %v2496_v53 = vunpack.c.h.bf16 %v2565_v16 }
 0x1e4   : > { %v2520_v59 = vpack.c.bf16 %v1862_v43, %v1861_v34  ;;  %v1697_v20 = vadd.f32 %v1655_v44, %v1507_v56  ;;  %v1803_v57 = vrot.slane %v2496_v53, 1 }
 0x1e6   : > { %2521 = vst [vmem:[#allocation2] sm:$0xff] %v2520_v59   ;;  %v1719_v60 = vadd.f32 %v3230_v8, %v1697_v20  ;;  %v1516_v30 = vpop.f32.mrf.mxu0  ;;  %v2499_v59 = vunpack.c.l.bf16 %v2566_v52 }
 0x1e8   : > { %v1845_v7 = vadd.f32 %v1796_v4, %v1719_v60 }
 0x1e9   : > { %v1394_v0 = vpop.f32.mrf.mxu3  ;;  %v1660_v27 = vpop.f32.mrf.mxu1 }
 0x1ea   : > { %v1509_v3 = vadd.f32 %v1508_v55, %v1394_v0  ;;  %v1863_v14 = vmax.f32 %v1845_v7, 0.0 }
 0x1ec   : > { %v1698_v62 = vadd.f32 %v1657_v61, %v1509_v3  ;;  %v1805_v3 = vrot.slane %v2499_v59, 1 }
 0x1ed   : > { %v1915_v5 = vld [vmem:[#allocation2] sm:$0xff]  }
 0x1ee   : > { %1917 = vst [vmem:[%s3241_s13] sm:$0xff] %v1915_v5   ;;  %v1720_v45 = vadd.f32 %v3230_v8, %v1698_v62  ;;  %v1518_v24 = vpop.f32.mrf.mxu0 }
 0x1f0   : > { %v1846_v9 = vadd.f32 %v1798_v6, %v1720_v45  ;;  %v1804_v6 = vsel %vm696_vm1, %v1801_v25, %v1803_v57  ;;  %v1806_v45 = vsel %vm696_vm1, %v1803_v57, %v1805_v3 }
 0x1f1   : > { %v1397_v12 = vpop.f32.mrf.mxu3  ;;  %v1662_v42 = vpop.f32.mrf.mxu1 }
 0x1f2   : > { %v1864_v15 = vmax.f32 %v1846_v9, 0.0  ;;  %v1512_v38 = vadd.f32 %v1511_v63, %v1397_v12 }
 0x1f4   : > { %v2525_v19 = vpack.c.bf16 %v1864_v15, %v1863_v14  ;;  %v1699_v21 = vadd.f32 %v1660_v27, %v1512_v38 }
 0x1f6   : > { %2571 = vst [vmem:[#allocation2 + $0x8] sm:$0xff] %v2525_v19   ;;  %v1721_v26 = vadd.f32 %v3230_v8, %v1699_v21  ;;  %v2500_v19 = vunpack.c.h.bf16 %v2566_v52 }
 0x1f8   : > { %v1847_v41 = vadd.f32 %v1800_v35, %v1721_v26 }
 0x1f9   : > { %v1399_v23 = vpop.f32.mrf.mxu3 }
 0x1fa   : > { %v1514_v28 = vadd.f32 %v1513_v11, %v1399_v23  ;;  %v1865_v48 = vmax.f32 %v1847_v41, 0.0  ;;  %v1807_v23 = vrot.slane %v2500_v19, 1  ;;  %v2569_v19 = vld [vmem:[%s2986_s8 + $0x38] sm:$0xff]  }
 0x1fc   : > { %v1700_v50 = vadd.f32 %v1662_v42, %v1514_v28  ;;  %v2503_v42 = vunpack.c.l.bf16 %v2567_v49  ;;  %v1808_v35 = vsel %vm696_vm1, %v1805_v3, %v1807_v23 }
 0x1fd   : > { %v1919_v31 = vld [vmem:[#allocation2 + $0x8] sm:$0xe]  ;;  %v1920_v32 = vld [vmem:[#allocation2 + $0xc] sm:$0xf] }
 0x1fe   : > { %v2398_v36 = vrot.slane %v1919_v31, 9  ;;  %v1930_v17 = vrot.slane %v1920_v32, 5  ;;  %v1722_v13 = vadd.f32 %v3230_v8, %v1700_v50  ;;  %v1521_v1 = vpop.f32.mrf.mxu0 }
 0x200   : > { %v1931_v10 = vsel %vm3248_vm8, %v2398_v36, %v1930_v17  ;;  %v1848_v46 = vadd.f32 %v1802_v33, %v1722_v13  ;;  %v1932_v34 = vrot.slane %v1930_v17, 4 }
 0x201   : > { %1937 = vst [vmem:[%s3241_s13 + $0x8] sm:$0xf] %v1931_v10  ;;  %v1665_v47 = vpop.f32.mrf.mxu1 }
 0x202   : > { %v1866_v51 = vmax.f32 %v1848_v46, 0.0 }
 0x204   : > { %v2530_v44 = vpack.c.bf16 %v1866_v51, %v1865_v48 }
 0x206   : > { %2572 = vst [vmem:[#allocation2 + $0x10] sm:$0xff] %v2530_v44   ;;  %v1523_v11 = vpop.f32.mrf.mxu0 }
 0x209   : > { %v1402_v55 = vpop.f32.mrf.mxu3  ;;  %v1667_v29 = vpop.f32.mrf.mxu1 }
 0x20a   : > { %v1517_v39 = vadd.f32 %v1516_v30, %v1402_v55  ;;  %v1809_v30 = vrot.slane %v2503_v42, 1 }
 0x20c   : > { %v1701_v63 = vadd.f32 %v1665_v47, %v1517_v39  ;;  %v1810_v46 = vsel %vm696_vm1, %v1807_v23, %v1809_v30 }
 0x20d   : > { %v1921_v43 = vld [vmem:[#allocation2 + $0x10] sm:$0x1]  ;;  %v1939_v56 = vld [vmem:[#allocation2 + $0x10] sm:$0xc]  ;;  %v1940_v58 = vld [vmem:[#allocation2 + $0x14] sm:$0xf] }
 0x20e   : > { %v1933_v61 = vrot.slane %v1921_v43, 5  ;;  %v2399_v37 = vrot.slane %v1939_v56, 10  ;;  %v1949_v20 = vrot.slane %v1940_v58, 6  ;;  %v1723_v62 = vadd.f32 %v3230_v8, %v1701_v63  ;;  %v1526_v25 = vpop.f32.mrf.mxu0  ;;  %v2568_v43 = vld [vmem:[%s2986_s8 + $0x30] sm:$0xff]  }
 0x20f   : > { %v2504_v58 = vunpack.c.h.bf16 %v2567_v49  ;;  %v2508_v49 = vunpack.c.h.bf16 %v2568_v43 }
 0x210   : > { %v1934_v0 = vsel %vm3248_vm8, %v1932_v34, %v1933_v61  ;;  %v1950_v2 = vsel %vm3259_vm15, %v2399_v37, %v1949_v20  ;;  %v1849_v27 = vadd.f32 %v1804_v6, %v1723_v62  ;;  %v1951_v33 = vrot.slane %v1949_v20, 4 }
 0x211   : > { %1938 = vst [vmem:[%s3241_s13 + $0xc] sm:$0xf] %v1934_v0  ;;  %v1404_v60 = vpop.f32.mrf.mxu3  ;;  %v1670_v4 = vpop.f32.mrf.mxu1  ;;  %v2507_v61 = vunpack.c.l.bf16 %v2568_v43  ;;  %v1811_v20 = vrot.slane %v2504_v58, 1 }
 0x212   : > { %1956 = vst [vmem:[%s3241_s13 + $0x10] sm:$0xf] %v1950_v2  ;;  %v1519_v5 = vadd.f32 %v1518_v24, %v1404_v60  ;;  %v1867_v38 = vmax.f32 %v1849_v27, 0.0 }
 0x213   : > { %v1813_v57 = vrot.slane %v2507_v61, 1  ;;  %v1812_v60 = vsel %vm696_vm1, %v1809_v30, %v1811_v20 }
 0x214   : > { %v1702_v7 = vadd.f32 %v1667_v29, %v1519_v5 }
 0x215   : > { %v1814_v6 = vsel %vm696_vm1, %v1811_v20, %v1813_v57 }
 0x216   : > { %v1724_v9 = vadd.f32 %v3230_v8, %v1702_v7  ;;  %v1528_v56 = vpop.f32.mrf.mxu0 }
 0x218   : > { %v1850_v12 = vadd.f32 %v1806_v45, %v1724_v9 }
 0x219   : > { %v1407_v14 = vpop.f32.mrf.mxu3  ;;  %v1672_v15 = vpop.f32.mrf.mxu1 }
 0x21a   : > { %v1868_v16 = vmax.f32 %v1850_v12, 0.0  ;;  %v1522_v18 = vadd.f32 %v1521_v1, %v1407_v14 }
 0x21c   : > { %v2535_v21 = vpack.c.bf16 %v1868_v16, %v1867_v38  ;;  %v1703_v22 = vadd.f32 %v1670_v4, %v1522_v18 }
 0x21e   : > { %2573 = vst [vmem:[#allocation2 + $0x18] sm:$0xff] %v2535_v21   ;;  %v1725_v26 = vadd.f32 %v3230_v8, %v1703_v22  ;;  %v1531_v4 = vpop.f32.mrf.mxu0  ;;  %v2511_v22 = vunpack.c.l.bf16 %v2569_v19 }
 0x220   : > { %v1851_v10 = vadd.f32 %v1808_v35, %v1725_v26  ;;  %v1817_v30 = vrot.slane %v2511_v22, 1 }
 0x221   : > { %v1409_v28 = vpop.f32.mrf.mxu3  ;;  %v1675_v31 = vpop.f32.mrf.mxu1 }
 0x222   : > { %v1524_v50 = vadd.f32 %v1523_v11, %v1409_v28  ;;  %v1869_v52 = vmax.f32 %v1851_v10, 0.0 }
 0x224   : > { %v1704_v36 = vadd.f32 %v1672_v15, %v1524_v50 }
 0x225   : > { %v1941_v17 = vld [vmem:[#allocation2 + $0x18] sm:$0x3]  ;;  %v1958_v41 = vld [vmem:[#allocation2 + $0x18] sm:$0x8]  ;;  %v1959_v13 = vld [vmem:[#allocation2 + $0x1c] sm:$0xf] }
 0x226   : > { %v1952_v47 = vrot.slane %v1941_v17, 6  ;;  %v2400_v48 = vrot.slane %v1958_v41, 11  ;;  %v1968_v51 = vrot.slane %v1959_v13, 7  ;;  %v1726_v44 = vadd.f32 %v3230_v8, %v1704_v36  ;;  %v1533_v23 = vpop.f32.mrf.mxu0 }
 0x228   : > { %v1953_v24 = vsel %vm3259_vm15, %v1951_v33, %v1952_v47  ;;  %v1969_v55 = vsel %vm3277_vm3, %v2400_v48, %v1968_v51  ;;  %v1852_v29 = vadd.f32 %v1810_v46, %v1726_v44  ;;  %v1970_v7 = vrot.slane %v1968_v51, 4 }
 0x229   : > { %1957 = vst [vmem:[%s3241_s13 + $0x14] sm:$0xf] %v1953_v24  ;;  %v1412_v39 = vpop.f32.mrf.mxu3  ;;  %v1677_v59 = vpop.f32.mrf.mxu1 }
 0x22a   : > { %1975 = vst [vmem:[%s3241_s13 + $0x18] sm:$0xf] %v1969_v55  ;;  %v1870_v53 = vmax.f32 %v1852_v29, 0.0  ;;  %v1527_v34 = vadd.f32 %v1526_v25, %v1412_v39  ;;  %v1815_v25 = vrot.slane %v2508_v49, 1  ;;  %v2570_v29 = vld [vmem:[%s2986_s8 + $0x40] sm:$0xff]   ;;  %v2512_v39 = vunpack.c.h.bf16 %v2569_v19 }
 0x22c   : > { %v2540_v1 = vpack.c.bf16 %v1870_v53, %v1869_v52  ;;  %v1705_v37 = vadd.f32 %v1675_v31, %v1527_v34  ;;  %v1816_v31 = vsel %vm696_vm1, %v1813_v57, %v1815_v25  ;;  %v1818_v17 = vsel %vm696_vm1, %v1815_v25, %v1817_v30 }
 0x22d   : > { %v2515_v52 = vunpack.c.l.bf16 %v2570_v29  ;;  %v1819_v58 = vrot.slane %v2512_v39, 1 }
 0x22e   : > { %2574 = vst [vmem:[#allocation2 + $0x20] sm:$0xff] %v2540_v1   ;;  %v1727_v0 = vadd.f32 %v3230_v8, %v1705_v37  ;;  %v1536_v46 = vpop.f32.mrf.mxu0 }
 0x230   : > { %v1853_v27 = vadd.f32 %v1812_v60, %v1727_v0 }
 0x231   : > { %v1414_v63 = vpop.f32.mrf.mxu3  ;;  %v1680_v11 = vpop.f32.mrf.mxu1 }
 0x232   : > { %v1529_v2 = vadd.f32 %v1528_v56, %v1414_v63  ;;  %v1871_v38 = vmax.f32 %v1853_v27, 0.0  ;;  %v1821_v63 = vrot.slane %v2515_v52, 1 }
 0x234   : > { %v1706_v3 = vadd.f32 %v1677_v59, %v1529_v2 }
 0x235   : > { %v1960_v62 = vld [vmem:[#allocation2 + $0x20] sm:$0x7]  ;;  %v1977_v5 = vld [vmem:[#allocation2 + $0x24] sm:$0xf] }
 0x236   : > { %v1971_v45 = vrot.slane %v1960_v62, 7  ;;  %1979 = vst [vmem:[%s3241_s13 + $0x20] sm:$0xf] %v1977_v5  ;;  %v1728_v9 = vadd.f32 %v3230_v8, %v1706_v3  ;;  %v1538_v34 = vpop.f32.mrf.mxu0  ;;  %v2516_v5 = vunpack.c.h.bf16 %v2570_v29 }
 0x238   : > { %v1972_v12 = vsel %vm3277_vm3, %v1970_v7, %v1971_v45  ;;  %v1854_v14 = vadd.f32 %v1814_v6, %v1728_v9  ;;  %v1822_v7 = vsel %vm696_vm1, %v1819_v58, %v1821_v63 }
 0x239   : > { %1976 = vst [vmem:[%s3241_s13 + $0x1c] sm:$0xf] %v1972_v12  ;;  %v1417_v15 = vpop.f32.mrf.mxu3  ;;  %v1682_v26 = vpop.f32.mrf.mxu1 }
 0x23a   : > { %v1872_v16 = vmax.f32 %v1854_v14, 0.0  ;;  %v1532_v18 = vadd.f32 %v1531_v4, %v1417_v15  ;;  %v1820_v4 = vsel %vm696_vm1, %v1817_v30, %v1819_v58  ;;  %v1823_v15 = vrot.slane %v2516_v5, 1 }
 0x23c   : > { %v2545_v21 = vpack.c.bf16 %v1872_v16, %v1871_v38  ;;  %v1707_v42 = vadd.f32 %v1680_v11, %v1532_v18 }
 0x23e   : > { %2575 = vst [vmem:[#allocation2 + $0x28] sm:$0xff] %v2545_v21   ;;  %v1729_v35 = vadd.f32 %v3230_v8, %v1707_v42  ;;  %v1541_v45 = vpop.f32.mrf.mxu0  ;;  %v1824_v21 = vsel %vm696_vm1, %v1821_v63, %v1823_v15 }
 0x240   : > { %v1855_v41 = vadd.f32 %v1816_v31, %v1729_v35 }
 0x241   : > { %v1419_v28 = vpop.f32.mrf.mxu3 }
 0x242   : > { %v1534_v50 = vadd.f32 %v1533_v23, %v1419_v28  ;;  %v1685_v47 = vpop.f32.mrf.mxu1  ;;  %v1873_v48 = vmax.f32 %v1855_v41, 0.0 }
 0x244   : > { %v1708_v33 = vadd.f32 %v1682_v26, %v1534_v50 }
 0x245   : > { %v1978_v36 = vld [vmem:[#allocation2 + $0x28] sm:$0xf]  ;;  %v1981_v53 = vld [vmem:[#allocation2 + $0x2c] sm:$0xe] }
 0x246   : > { %1980 = vst [vmem:[%s3241_s13 + $0x24] sm:$0xf] %v1978_v36  ;;  %v1730_v13 = vadd.f32 %v3230_v8, %v1708_v33  ;;  %v2401_v37 = vrot.slane %v1981_v53, 9  ;;  %v1543_v42 = vpop.f32.mrf.mxu0 }
 0x248   : > { %v1856_v10 = vadd.f32 %v1818_v17, %v1730_v13 }
 0x24a   : > { %v1874_v51 = vmax.f32 %v1856_v10, 0.0  ;;  %v1422_v24 = vpop.f32.mrf.mxu3  ;;  %v1687_v56 = vpop.f32.mrf.mxu1 }
 0x24b   : > { %v1537_v55 = vadd.f32 %v1536_v46, %v1422_v24 }
 0x24c   : > { %v2550_v44 = vpack.c.bf16 %v1874_v51, %v1873_v48 }
 0x24d   : > { %v1709_v43 = vadd.f32 %v1685_v47, %v1537_v55 }
 0x24e   : > { %2576 = vst [vmem:[#allocation2 + $0x30] sm:$0xff] %v2550_v44  }
 0x24f   : > { %v1731_v57 = vadd.f32 %v3230_v8, %v1709_v43 }
 0x251   : > { %v1857_v27 = vadd.f32 %v1820_v4, %v1731_v57 }
 0x252   : > { %v1424_v61 = vpop.f32.mrf.mxu3  ;;  %v1690_v12 = vpop.f32.mrf.mxu1 }
 0x253   : > { %v1539_v0 = vadd.f32 %v1538_v34, %v1424_v61  ;;  %v1875_v16 = vmax.f32 %v1857_v27, 0.0 }
 0x255   : > { %v1982_v1 = vld [vmem:[#allocation2 + $0x30] sm:$0xf]  ;;  %v1983_v59 = vld [vmem:[#allocation2 + $0x34] sm:$0x1]  ;;  %v1710_v62 = vadd.f32 %v1687_v56, %v1539_v0  ;;  %v1998_v30 = vld [vmem:[#allocation2 + $0x34] sm:$0xc] }
 0x256   : > { %v1989_v20 = vrot.slane %v1982_v1, 5  ;;  %v1992_v3 = vrot.slane %v1983_v59, 5  ;;  %v2402_v17 = vrot.slane %v1998_v30, 10 }
 0x257   : > { %v1732_v9 = vadd.f32 %v3230_v8, %v1710_v62 }
 0x258   : > { %v1990_v2 = vsel %vm3248_vm8, %v2401_v37, %v1989_v20  ;;  %v1991_v60 = vrot.slane %v1989_v20, 4 }
 0x259   : > { %1996 = vst [vmem:[%s3241_s13 + $0x28] sm:$0xf] %v1990_v2  ;;  %v1858_v11 = vadd.f32 %v1822_v7, %v1732_v9 }
 0x25a   : > { %v1993_v6 = vsel %vm3248_vm8, %v1991_v60, %v1992_v3  ;;  %v1427_v14 = vpop.f32.mrf.mxu3  ;;  %v1692_v28 = vpop.f32.mrf.mxu1 }
 0x25b   : > { %1997 = vst [vmem:[%s3241_s13 + $0x2c] sm:$0xf] %v1993_v6  ;;  %v1542_v38 = vadd.f32 %v1541_v45, %v1427_v14  ;;  %v1876_v18 = vmax.f32 %v1858_v11, 0.0 }
 0x25d   : > { %v1711_v19 = vadd.f32 %v1690_v12, %v1542_v38  ;;  %v2555_v49 = vpack.c.bf16 %v1876_v18, %v1875_v16 }
 0x25f   : > { %v1733_v40 = vadd.f32 %v3230_v8, %v1711_v19  ;;  %2577 = vst [vmem:[#allocation2 + $0x38] sm:$0xff] %v2555_v49  }
 0x261   : > { %v1859_v22 = vadd.f32 %v1824_v21, %v1733_v40 }
 0x262   : > { %v1429_v23 = vpop.f32.mrf.mxu3 }
 0x263   : > { %v1877_v25 = vmax.f32 %v1859_v22, 0.0  ;;  %v1544_v26 = vadd.f32 %v1543_v42, %v1429_v23 }
 0x265   : > { %v1895_v35 = vpack.c.bf16 %v1877_v25, %v1877_v25  ;;  %v1712_v50 = vadd.f32 %v1692_v28, %v1544_v26 }
 0x266   : > { %v1999_v31 = vld [vmem:[#allocation2 + $0x38] sm:$0xf]  ;;  %v2000_v33 = vld [vmem:[#allocation2 + $0x3c] sm:$0x3]  ;;  %v2015_v44 = vld [vmem:[#allocation2 + $0x3c] sm:$0x8] }
 0x267   : > { %1913 = vst [vmem:[#allocation2 + $0x40] sm:$0xf] %v1895_v35  ;;  %v1734_v36 = vadd.f32 %v3230_v8, %v1712_v50  ;;  %v2006_v41 = vrot.slane %v1999_v31, 6  ;;  %v2009_v47 = vrot.slane %v2000_v33, 6  ;;  %v2403_v8 = vrot.slane %v2015_v44, 11 }
 0x269   : > { %v1860_v13 = vadd.f32 %v1823_v15, %v1734_v36  ;;  %v2007_v10 = vsel %vm3259_vm15, %v2402_v17, %v2006_v41  ;;  %v2008_v46 = vrot.slane %v2006_v41, 4 }
 0x26a   : > { %2013 = vst [vmem:[%s3241_s13 + $0x30] sm:$0xf] %v2007_v10 }
 0x26b   : > { %v1878_v48 = vmax.f32 %v1860_v13, 0.0  ;;  %v2010_v51 = vsel %vm3259_vm15, %v2008_v46, %v2009_v47 }
 0x26c   : > { %2014 = vst [vmem:[%s3241_s13 + $0x34] sm:$0xf] %v2010_v51 }
 0x26d   : > { %v1896_v24 = vpack.c.bf16 %v1878_v48, %v1878_v48 }
 0x26e   : > { %v2016_v55 = vld [vmem:[#allocation2 + $0x40] sm:$0xf] }
 0x26f   : > { %v2023_v29 = vrot.slane %v2016_v55, 7  ;;  %1914 = vst [vmem:[#allocation2 + $0x44] sm:$0x7] %v1896_v24 }
 0x271   : > { %v2024_v39 = vsel %vm3277_vm3, %v2403_v8, %v2023_v29  ;;  %v2025_v52 = vrot.slane %v2023_v29, 4 }
 0x272   : > { %2030 = vst [vmem:[%s3241_s13 + $0x38] sm:$0xf] %v2024_v39 }
 0x276   : > { %v2017_v54 = vld [vmem:[#allocation2 + $0x44] sm:$0x7] }
 0x277   : > { %v2026_v53 = vrot.slane %v2017_v54, 7 }
 0x279   : > { %v2027_v34 = vsel %vm3277_vm3, %v2025_v52, %v2026_v53 }
 0x27a   : > { %2031 = vst [vmem:[%s3241_s13 + $0x3c] sm:$0xf] %v2027_v34 }
 0x27b   : > { %2794 = shalt.err (!%p2791_p10)
}
 0x27c   : > { %s2845_s1 = smov 64   ;;  %s2846_s9 = smov 4  }
 0x27d   : > { %2606 = dma.vmem_to_hbm [thread:$0]  (%p2949_p3), %s2046_s28, 1024, %s2048_s26, %s2033_s22, %s2845_s1, %s2845_s1, %s2846_s9  }
 0x27e PF: > { %s2062_s12 = sand.u32 1, %s2827_s18   ;;  %p3399_p12 = scmp.ge.s32.totalorder %s2839_s21, 2 }
 0x27f   : > { %s2063_s13 = scalar_lea.sflag [#allocation5], %s2062_s12 }
 0x280   : > { %p2620_p13 = pnand %p3399_p12, %p2912_p6 }
 0x282   : > { %p2621_p0 = pneg %p2620_p13 }
 0x284   : > { %2820 = dma.done.wait (%p2621_p0), %s2063_s13, 1024  }
 0x285   : > { %2822 = vsyncadd (%p2621_p0), %s2063_s13, 4294966272  ;;  %p19_p5 = scmp.ge.s32.totalorder %s2939_s14, 4   ;;  %s3400_s18 = smov %s2831_s19 }
 0x286   : > { %s3401_s19 = smov %s2835_s20  ;;  %s3402_s20 = smov %s2955_s23 }
 0x287   : > { %s3403_s21 = smov %s2939_s14  ;;  %21 = sbr.rel (!%p19_p5) target bundleno = 8 (0x8), region = 97 }
 0x28c   :  { %2069 = vsyncpa [#allocation4], 1 }
 0x28d   :  { %2071 = vsyncpa [#allocation4 + $0x1], 1 }
 0x28e   :  { %2072 = vsyncpa [#allocation7], 1 }
 0x28f   :  { %2073 = vsyncpa [#allocation5], 1 }
 0x290   :  { %2075 = vsyncpa [#allocation5 + $0x1], 1 }

</bundles_post_ra>
